<compile_context>
chip_gen: v7x
topology: tpu7x:2x2x1
jax: 0.10.0
libtpu: 0.0.40
codegen_flags: <defaults>
</compile_context>

<pallas_src>
import functools

import jax
import jax.numpy as jnp
from jax.experimental import pallas as pl
from jax.experimental.pallas import tpu as pltpu

_EPS = 1e-5
_VMEM_LIMIT = 48 * 1024 * 1024   # scoped-VMEM budget; safe on v5e/v6e/v7x
_TM_CAP = 512                    # M (rows) tile cap
_TK_CAP = 1024                   # contraction tile cap (A-side block rows)


def _round_up(x, m):
    return (x + m - 1) // m * m


def _pick_tk(k_pad, cap=_TK_CAP):
    """Pick a K tile: single tile if it fits, else a 128-multiple divisor of
    k_pad (no extra padding), else a balanced padded split."""
    if k_pad <= cap:
        return k_pad, k_pad
    for t in range(cap, 127, -128):
        if k_pad % t == 0:
            return t, k_pad
    nk = -(-k_pad // cap)
    tk = _round_up(-(-k_pad // nk), 128)
    return tk, tk * nk


def _bn_row_tile(m_pad, tm, c_pad, target_bytes=2 * 1024 * 1024):
    """Row tile for the elementwise BN kernels: largest multiple of the matmul
    row tile that divides m_pad while keeping a block around ~2 MiB (bf16)."""
    cap_rows = max(tm, target_bytes // (2 * c_pad))
    nt = m_pad // tm
    for f in range(nt, 0, -1):
        if nt % f == 0 and tm * f <= cap_rows:
            return tm * f
    return tm


# ----------------------------- Pallas kernels -----------------------------

def _mm_stats_kernel(a_ref, b_ref, o_ref, st_ref, acc_ref, *, tk):
    """Tiled matmul with fused per-channel sum / sum-of-squares epilogue.

    Grid = (j over Cout tiles, i over M tiles, k over K tiles).
    a_ref   : (tm, tk) bf16 im2col tile
    b_ref   : (k_pad, tn) bf16 weight slab, resident across i and k
    o_ref   : (tm, tn) bf16 conv output tile
    st_ref  : (8, tn) f32 per-(i,j)-tile stats; row 0 = sum, row 1 = sum of sq
    acc_ref : (tm, tn) f32 accumulator scratch
    """
    k = pl.program_id(2)
    nk = pl.num_programs(2)

    ks = pl.multiple_of(k * tk, tk)
    prod = jnp.dot(a_ref[...], b_ref[pl.ds(ks, tk), :],
                   preferred_element_type=jnp.float32)

    @pl.when(k == 0)
    def _first():
        acc_ref[...] = prod

    @pl.when(k > 0)
    def _accumulate():
        acc_ref[...] += prod

    @pl.when(k == nk - 1)
    def _finalize():
        c = acc_ref[...]
        o_ref[...] = c.astype(o_ref.dtype)
        # Per-M-tile partial stats (reduced across tiles outside the kernel).
        st_ref[...] = jnp.concatenate(
            [jnp.sum(c, axis=0, keepdims=True),
             jnp.sum(c * c, axis=0, keepdims=True),
             jnp.zeros((6, c.shape[1]), jnp.float32)], axis=0)


def _bn_relu_kernel(x_ref, s_ref, b_ref, o_ref):
    y = x_ref[...].astype(jnp.float32) * s_ref[...] + b_ref[...]
    o_ref[...] = jnp.maximum(y, 0.0).astype(o_ref.dtype)


def _bn_add_relu_kernel(x_ref, s_ref, b_ref, r_ref, o_ref):
    y = (x_ref[...].astype(jnp.float32) * s_ref[...] + b_ref[...]
         + r_ref[...].astype(jnp.float32))
    o_ref[...] = jnp.maximum(y, 0.0).astype(o_ref.dtype)


# --------------------------- Pallas call wrappers --------------------------

def _pallas_conv_matmul(a, b, tm, tn, tk):
    """a: (M_pad, K_pad) bf16, b: (K_pad, C_pad) bf16 -> (conv bf16, stats f32).

    stats has shape (num_M_tiles * 8, C_pad); rows (8*i + 0, 8*i + 1) hold the
    per-M-tile partial sum / sum-of-squares.
    """
    m_pad, k_pad = a.shape
    _, c_pad = b.shape
    ni, nj, nk = m_pad // tm, c_pad // tn, k_pad // tk
    grid = (nj, ni, nk)

    kernel = functools.partial(_mm_stats_kernel, tk=tk)
    return pl.pallas_call(
        kernel,
        out_shape=(jax.ShapeDtypeStruct((m_pad, c_pad), jnp.bfloat16),
                   jax.ShapeDtypeStruct((ni * 8, c_pad), jnp.float32)),
        grid=grid,
        in_specs=[pl.BlockSpec((tm, tk), lambda j, i, k: (i, k)),
                  # Weight slab resident over i and k: re-DMA'd only per j.
                  pl.BlockSpec((k_pad, tn), lambda j, i, k: (0, j))],
        out_specs=(pl.BlockSpec((tm, tn), lambda j, i, k: (i, j)),
                   pl.BlockSpec((8, tn), lambda j, i, k: (i, j))),
        scratch_shapes=[pltpu.VMEM((tm, tn), jnp.float32)],
        compiler_params=pltpu.CompilerParams(
            dimension_semantics=("parallel", "parallel", "arbitrary"),
            vmem_limit_bytes=_VMEM_LIMIT),
        cost_estimate=pl.CostEstimate(
            flops=2 * m_pad * c_pad * k_pad,
            transcendentals=0,
            bytes_accessed=2 * m_pad * k_pad * nj          # A re-read per j slab
                           + 2 * k_pad * c_pad             # B read once
                           + 2 * m_pad * c_pad             # output
                           + 4 * ni * 8 * c_pad),          # stats
    )(a, b)


def _pallas_bn_relu(x, scale, bias, tm_rows):
    m_pad, c_pad = x.shape
    return pl.pallas_call(
        _bn_relu_kernel,
        out_shape=jax.ShapeDtypeStruct((m_pad, c_pad), jnp.bfloat16),
        grid=(m_pad // tm_rows,),
        in_specs=[pl.BlockSpec((tm_rows, c_pad), lambda i: (i, 0)),
                  pl.BlockSpec((1, c_pad), lambda i: (0, 0)),
                  pl.BlockSpec((1, c_pad), lambda i: (0, 0))],
        out_specs=pl.BlockSpec((tm_rows, c_pad), lambda i: (i, 0)),
        compiler_params=pltpu.CompilerParams(
            dimension_semantics=("parallel",),
            vmem_limit_bytes=_VMEM_LIMIT),
    )(x, scale, bias)


def _pallas_bn_add_relu(x, scale, bias, resid, tm_rows):
    m_pad, c_pad = x.shape
    return pl.pallas_call(
        _bn_add_relu_kernel,
        out_shape=jax.ShapeDtypeStruct((m_pad, c_pad), jnp.bfloat16),
        grid=(m_pad // tm_rows,),
        in_specs=[pl.BlockSpec((tm_rows, c_pad), lambda i: (i, 0)),
                  pl.BlockSpec((1, c_pad), lambda i: (0, 0)),
                  pl.BlockSpec((1, c_pad), lambda i: (0, 0)),
                  pl.BlockSpec((tm_rows, c_pad), lambda i: (i, 0))],
        out_specs=pl.BlockSpec((tm_rows, c_pad), lambda i: (i, 0)),
        compiler_params=pltpu.CompilerParams(
            dimension_semantics=("parallel",),
            vmem_limit_bytes=_VMEM_LIMIT),
    )(x, scale, bias, resid)


# ------------------------------ glue helpers ------------------------------

def _conv_bn_stats(x_nhwc, w, stride, pad):
    """Conv2d (no bias) + fused BN batch-statistics.

    x_nhwc may carry zero-padded channels; instead of slicing them away, the
    weight's input-channel dim is zero-padded to match (identical result, no
    extra HBM copy of the activation).
    Returns:
      conv_flat : (M_pad, C_pad) bf16 conv output (padded rows/channels are 0)
      stats     : (num_M_tiles*8, C_pad) f32 per-tile partial sums/sumsq
      geom      : dict of geometry / tiling info
    """
    kh, kw, cin, cout = w.shape
    n, h, wdim, c_avail = x_nhwc.shape
    x = x_nhwc.astype(jnp.bfloat16)
    if c_avail > cin:
        w = jnp.pad(w, ((0, 0), (0, 0), (0, c_avail - cin), (0, 0)))
    cin_eff = c_avail

    ho = (h + 2 * pad - kh) // stride + 1
    wo = (wdim + 2 * pad - kw) // stride + 1
    m = n * ho * wo
    kdim = kh * kw * cin_eff

    xp = jnp.pad(x, ((0, 0), (pad, pad), (pad, pad), (0, 0))) if pad else x
    cols = []
    for dy in range(kh):
        for dx in range(kw):
            cols.append(xp[:, dy:dy + (ho - 1) * stride + 1:stride,
                              dx:dx + (wo - 1) * stride + 1:stride, :])
    patches = jnp.concatenate(cols, axis=-1).reshape(m, kdim)

    # Padded / tiled sizes (lane-dense channels, MXU-aligned contraction).
    c_pad = _round_up(cout, 128)
    if c_pad <= 512:
        tn = c_pad                      # single Cout tile: A read from HBM once
    elif c_pad % 256 == 0:
        tn = 256
    else:
        tn = 128
    tm = min(_TM_CAP, _round_up(m, 8))
    m_pad = _round_up(m, tm)
    tk, k_pad = _pick_tk(_round_up(kdim, 128))

    # Single fused pad instead of zeros().at[].set() (no extra HBM round trip).
    a = jnp.pad(patches, ((0, m_pad - m), (0, k_pad - kdim)))
    b = jnp.pad(w.reshape(kdim, cout).astype(jnp.bfloat16),
                ((0, k_pad - kdim), (0, c_pad - cout)))

    conv_flat, stats = _pallas_conv_matmul(a, b, tm, tn, tk)
    geom = dict(N=n, Ho=ho, Wo=wo, Cout=cout, M=m, M_pad=m_pad,
                C_pad=c_pad, tm=tm)
    return conv_flat, stats, geom


def _bn_fold(stats, gamma, beta, m_true, c_pad):
    """Training-mode BN folded to per-channel scale/bias from fused sums.

    Note: variance via E[x^2]-E[x]^2 from f32 per-tile partial sums; clamped
    at 0 to guard against cancellation (adequate for forward-pass accuracy).
    """
    st = stats.reshape(-1, 8, c_pad)
    s1 = jnp.sum(st[:, 0, :], axis=0)               # (C_pad,)
    s2 = jnp.sum(st[:, 1, :], axis=0)
    mean = s1 / m_true
    var = jnp.maximum(s2 / m_true - mean * mean, 0.0)   # biased var (PyTorch fwd)
    g = jnp.pad(gamma.astype(jnp.float32), (0, c_pad - gamma.shape[0]))
    b = jnp.pad(beta.astype(jnp.float32), (0, c_pad - beta.shape[0]))
    scale = g * jax.lax.rsqrt(var + _EPS)
    bias = b - mean * scale
    return scale.reshape(1, c_pad), bias.reshape(1, c_pad)


# ------------------------------ conv2Block --------------------------------

def conv2_block_forward(x_nhwc, p, stride, projection):
    k = p["w1"].shape[0]

    # conv1 -> bn1 -> relu
    c1, st1, g1 = _conv_bn_stats(x_nhwc, p["w1"], stride=stride, pad=1)
    sc1, bi1 = _bn_fold(st1, p["g1"], p["be1"], g1["M"], g1["C_pad"])
    a1 = _pallas_bn_relu(c1, sc1, bi1,
                         _bn_row_tile(g1["M_pad"], g1["tm"], g1["C_pad"]))
    a1_nhwc = a1[:g1["M"]].reshape(g1["N"], g1["Ho"], g1["Wo"], g1["C_pad"])

    # conv2 (padding='same', stride 1) -> bn2   (assumes odd kernel size)
    c2, st2, g2 = _conv_bn_stats(a1_nhwc, p["w2"], stride=1, pad=(k - 1) // 2)
    sc2, bi2 = _bn_fold(st2, p["g2"], p["be2"], g2["M"], g2["C_pad"])

    # residual branch
    if projection:
        # 1x1 conv, stride 2 (matching the PyTorch module) -> bn -> relu
        # (the reference applies ReLU on the shortcut: x = relu(bn_p(proj(x)))).
        cp, stp, gp = _conv_bn_stats(x_nhwc, p["wp"], stride=2, pad=0)
        scp, bip = _bn_fold(stp, p["gp"], p["bep"], gp["M"], gp["C_pad"])
        resid = _pallas_bn_relu(cp, scp, bip,
                                _bn_row_tile(gp["M_pad"], gp["tm"], gp["C_pad"]))
    else:
        # identity shortcut: valid only when in_channels == out_channels.
        # Zero-copy reshape when row/channel padding already matches.
        xr = x_nhwc.astype(jnp.bfloat16).reshape(-1, x_nhwc.shape[-1])
        mr, cr = xr.shape
        if (mr, cr) != (g2["M_pad"], g2["C_pad"]):
            xr = jnp.pad(xr, ((0, g2["M_pad"] - mr), (0, g2["C_pad"] - cr)))
        resid = xr

    assert resid.shape == c2.shape, (resid.shape, c2.shape)
    out = _pallas_bn_add_relu(c2, sc2, bi2, resid,
                              _bn_row_tile(g2["M_pad"], g2["tm"], g2["C_pad"]))
    return out[:g2["M"]].reshape(g2["N"], g2["Ho"], g2["Wo"], g2["C_pad"])


# ----------------------------- conv2nBlock --------------------------------

def init_conv2_block_params(key, in_c, out_c, k, projection):
    k0, k1, k2 = jax.random.split(key, 3)
    p = {
        "w1": 0.1 * jax.random.normal(k0, (k, k, in_c, out_c), jnp.float32),
        "g1": jnp.ones((out_c,), jnp.float32),
        "be1": jnp.zeros((out_c,), jnp.float32),
        "w2": 0.1 * jax.random.normal(k1, (k, k, out_c, out_c), jnp.float32),
        "g2": jnp.ones((out_c,), jnp.float32),
        "be2": jnp.zeros((out_c,), jnp.float32),
    }
    if projection:
        p["wp"] = 0.1 * jax.random.normal(k2, (1, 1, in_c, out_c), jnp.float32)
        p["gp"] = jnp.ones((out_c,), jnp.float32)
        p["bep"] = jnp.zeros((out_c,), jnp.float32)
    return p


def init_conv2n_block_params(key, n, in_c, out_c, k, stride):
    keys = jax.random.split(key, n)
    params = [init_conv2_block_params(keys[0], in_c, out_c, k, stride == 2)]
    for i in range(1, n):
        params.append(init_conv2_block_params(keys[i], out_c, out_c, k, False))
    return params


def conv2n_block_forward(x_nchw, params, stride):
    x = jnp.transpose(x_nchw, (0, 2, 3, 1))              # NCHW -> NHWC
    x = conv2_block_forward(x, params[0], stride=stride,
                            projection=(stride == 2))
    for p in params[1:]:
        x = conv2_block_forward(x, p, stride=1, projection=False)
    cout = params[-1]["w2"].shape[-1]
    x = x[..., :cout].astype(jnp.float32)                # drop channel padding
    return jnp.transpose(x, (0, 3, 1, 2))                # NHWC -> NCHW


# --------------------------------- main ------------------------------------

if __name__ == "__main__":
    key = jax.random.PRNGKey(0)
    kx, kp = jax.random.split(key)

    # conv2nBlock(n=2, in_channels=4, out_channels=8, kernel_size=3, stride=2)
    N, Cin, H, W = 2, 4, 16, 16
    n_blocks, Cout, K, stride = 2, 8, 3, 2

    x = jax.random.normal(kx, (N, Cin, H, W), jnp.float32)  # NCHW, like PyTorch
    params = init_conv2n_block_params(kp, n_blocks, Cin, Cout, K, stride)

    fwd = jax.jit(conv2n_block_forward, static_argnums=(2,))
    out = fwd(x, params, stride)
    out = jax.block_until_ready(out)
    assert out.shape == (N, Cout, H // 2, W // 2), out.shape
    assert bool(jnp.all(jnp.isfinite(out)))
    print("KERNEL_OK")
</pallas_src>

<mosaic_0001>
module attributes {stable_mosaic.version = 11 : i64} {
  func.func @_bn_relu_kernel(%arg0: i32, %arg1: memref<128x128xbf16, #tpu.memory_space<vmem>>, %arg2: memref<1x128xf32, #tpu.memory_space<vmem>>, %arg3: memref<1x128xf32, #tpu.memory_space<vmem>>, %arg4: memref<128x128xbf16, #tpu.memory_space<vmem>>) attributes {dimension_semantics = [#tpu.dimension_semantics<parallel>], iteration_bounds = array<i64: 1>, scalar_prefetch = 0 : i64, scratch_operands = 0 : i64, tpu.core_type = #tpu.core_type<tc>, window_params = [{transform_indices = @transform_0, window_bounds = array<i64: 128, 128>}, {pipeline_mode = #tpu.pipeline_mode<synchronous>, transform_indices = @transform_1, window_bounds = array<i64: 1, 128>}, {pipeline_mode = #tpu.pipeline_mode<synchronous>, transform_indices = @transform_2, window_bounds = array<i64: 1, 128>}, {transform_indices = @transform_3, window_bounds = array<i64: 128, 128>}]} {
    %c0 = arith.constant 0 : index
    %c0_0 = arith.constant 0 : index
    %0 = vector.load %arg1[%c0, %c0_0] : memref<128x128xbf16, #tpu.memory_space<vmem>>, vector<128x128xbf16>
    %1 = arith.extf %0 : vector<128x128xbf16> to vector<128x128xf32>
    %c0_1 = arith.constant 0 : index
    %c0_2 = arith.constant 0 : index
    %2 = vector.load %arg2[%c0_1, %c0_2] : memref<1x128xf32, #tpu.memory_space<vmem>>, vector<1x128xf32>
    %3 = vector.broadcast %2 : vector<1x128xf32> to vector<128x128xf32>
    %4 = arith.mulf %1, %3 : vector<128x128xf32>
    %c0_3 = arith.constant 0 : index
    %c0_4 = arith.constant 0 : index
    %5 = vector.load %arg3[%c0_3, %c0_4] : memref<1x128xf32, #tpu.memory_space<vmem>>, vector<1x128xf32>
    %6 = vector.broadcast %5 : vector<1x128xf32> to vector<128x128xf32>
    %7 = arith.addf %4, %6 : vector<128x128xf32>
    %cst = arith.constant 0.000000e+00 : f32
    %8 = vector.broadcast %cst : f32 to vector<128x128xf32>
    %9 = arith.maximumf %7, %8 : vector<128x128xf32>
    %10 = arith.truncf %9 : vector<128x128xf32> to vector<128x128xbf16>
    %c0_5 = arith.constant 0 : index
    %c0_6 = arith.constant 0 : index
    %11 = vector.load %arg4[%c0_5, %c0_6] : memref<128x128xbf16, #tpu.memory_space<vmem>>, vector<128x128xbf16>
    tpu.vector_store %arg4[%c0_5, %c0_6], %10 {strides = array<i32>} : memref<128x128xbf16, #tpu.memory_space<vmem>>, vector<128x128xbf16>,
    return
  }
  func.func @transform_0(%arg0: i32) -> (i32, i32) {
    %c0_i32 = arith.constant 0 : i32
    %c0_i32_0 = arith.constant 0 : i32
    return %arg0, %c0_i32 : i32, i32
  }
  func.func @transform_1(%arg0: i32) -> (i32, i32) {
    %c0_i32 = arith.constant 0 : i32
    %c0_i32_0 = arith.constant 0 : i32
    %c0_i32_1 = arith.constant 0 : i32
    return %c0_i32, %c0_i32_0 : i32, i32
  }
  func.func @transform_2(%arg0: i32) -> (i32, i32) {
    %c0_i32 = arith.constant 0 : i32
    %c0_i32_0 = arith.constant 0 : i32
    %c0_i32_1 = arith.constant 0 : i32
    return %c0_i32, %c0_i32_0 : i32, i32
  }
  func.func @transform_3(%arg0: i32) -> (i32, i32) {
    %c0_i32 = arith.constant 0 : i32
    %c0_i32_0 = arith.constant 0 : i32
    return %arg0, %c0_i32 : i32, i32
  }
}

module attributes {stable_mosaic.version = 11 : i64} {
  func.func @_mm_stats_kernel(%arg0: i32, %arg1: i32, %arg2: i32, %arg3: memref<128x128xbf16, #tpu.memory_space<vmem>>, %arg4: memref<128x128xbf16, #tpu.memory_space<vmem>>, %arg5: memref<128x128xbf16, #tpu.memory_space<vmem>>, %arg6: memref<8x128xf32, #tpu.memory_space<vmem>>, %arg7: memref<128x128xf32, #tpu.memory_space<vmem>>) attributes {dimension_semantics = [#tpu.dimension_semantics<parallel>, #tpu.dimension_semantics<parallel>, #tpu.dimension_semantics<arbitrary>], iteration_bounds = array<i64: 1, 1, 1>, scalar_prefetch = 0 : i64, scratch_operands = 1 : i64, tpu.core_type = #tpu.core_type<tc>, window_params = [{transform_indices = @transform_0, window_bounds = array<i64: 128, 128>}, {transform_indices = @transform_1, window_bounds = array<i64: 128, 128>}, {transform_indices = @transform_2, window_bounds = array<i64: 128, 128>}, {transform_indices = @transform_3, window_bounds = array<i64: 8, 128>}]} {
    %c128_i32 = arith.constant 128 : i32
    %0 = arith.muli %arg2, %c128_i32 : i32
    %1 = tpu.assume_multiple %0, 128 : i32
    %c0 = arith.constant 0 : index
    %c0_0 = arith.constant 0 : index
    %2 = vector.load %arg3[%c0, %c0_0] : memref<128x128xbf16, #tpu.memory_space<vmem>>, vector<128x128xbf16>
    %3 = arith.index_cast %1 : i32 to index
    %c0_1 = arith.constant 0 : index
    %4 = vector.load %arg4[%3, %c0_1] : memref<128x128xbf16, #tpu.memory_space<vmem>>, vector<128x128xbf16>
    %cst = arith.constant dense<0.000000e+00> : vector<128x128xf32>
    %5 = tpu.matmul %2, %4, %cst {dimension_numbers = #tpu.dot_dimension_numbers<[1], [0], [0], [1], [0, 0, 1, 1], [], []>} : vector<128x128xbf16>, vector<128x128xbf16>, vector<128x128xf32> -> vector<128x128xf32>
    %c0_i32 = arith.constant 0 : i32
    %6 = arith.cmpi eq, %arg2, %c0_i32 : i32
    %7 = arith.extui %6 : i1 to i32
    %c0_i32_2 = arith.constant 0 : i32
    %8 = arith.cmpi ne, %7, %c0_i32_2 : i32
    scf.if %8 {
      %c0_7 = arith.constant 0 : index
      %c0_8 = arith.constant 0 : index
      %15 = vector.load %arg7[%c0_7, %c0_8] : memref<128x128xf32, #tpu.memory_space<vmem>>, vector<128x128xf32>
      tpu.vector_store %arg7[%c0_7, %c0_8], %5 {strides = array<i32>} : memref<128x128xf32, #tpu.memory_space<vmem>>, vector<128x128xf32>,
    } else {
    }
    %c0_i32_3 = arith.constant 0 : i32
    %9 = arith.cmpi sgt, %arg2, %c0_i32_3 : i32
    %10 = arith.extui %9 : i1 to i32
    %c0_i32_4 = arith.constant 0 : i32
    %11 = arith.cmpi ne, %10, %c0_i32_4 : i32
    scf.if %11 {
      %c0_7 = arith.constant 0 : index
      %c0_8 = arith.constant 0 : index
      %15 = vector.load %arg7[%c0_7, %c0_8] : memref<128x128xf32, #tpu.memory_space<vmem>>, vector<128x128xf32>
      %16 = arith.addf %15, %5 : vector<128x128xf32>
      %c0_9 = arith.constant 0 : index
      %c0_10 = arith.constant 0 : index
      %17 = vector.load %arg7[%c0_9, %c0_10] : memref<128x128xf32, #tpu.memory_space<vmem>>, vector<128x128xf32>
      tpu.vector_store %arg7[%c0_9, %c0_10], %16 {strides = array<i32>} : memref<128x128xf32, #tpu.memory_space<vmem>>, vector<128x128xf32>,
    } else {
    }
    %c0_i32_5 = arith.constant 0 : i32
    %12 = arith.cmpi eq, %arg2, %c0_i32_5 : i32
    %13 = arith.extui %12 : i1 to i32
    %c0_i32_6 = arith.constant 0 : i32
    %14 = arith.cmpi ne, %13, %c0_i32_6 : i32
    scf.if %14 {
      %c0_7 = arith.constant 0 : index
      %c0_8 = arith.constant 0 : index
      %15 = vector.load %arg7[%c0_7, %c0_8] : memref<128x128xf32, #tpu.memory_space<vmem>>, vector<128x128xf32>
      %16 = arith.truncf %15 : vector<128x128xf32> to vector<128x128xbf16>
      %c0_9 = arith.constant 0 : index
      %c0_10 = arith.constant 0 : index
      %17 = vector.load %arg5[%c0_9, %c0_10] : memref<128x128xbf16, #tpu.memory_space<vmem>>, vector<128x128xbf16>
      tpu.vector_store %arg5[%c0_9, %c0_10], %16 {strides = array<i32>} : memref<128x128xbf16, #tpu.memory_space<vmem>>, vector<128x128xbf16>,
      %cst_11 = arith.constant dense<0.000000e+00> : vector<128xf32>
      %18 = vector.multi_reduction <add>, %15, %cst_11 [0] : vector<128x128xf32> to vector<128xf32>
      %19 = vector.shape_cast %18 : vector<128xf32> to vector<1x128xf32>
      %20 = arith.mulf %15, %15 : vector<128x128xf32>
      %cst_12 = arith.constant dense<0.000000e+00> : vector<128xf32>
      %21 = vector.multi_reduction <add>, %20, %cst_12 [0] : vector<128x128xf32> to vector<128xf32>
      %22 = vector.shape_cast %21 : vector<128xf32> to vector<1x128xf32>
      %cst_13 = arith.constant 0.000000e+00 : f32
      %23 = vector.broadcast %cst_13 : f32 to vector<6x128xf32>
      %24 = tpu.concatenate %19, %22, %23 in 0 : vector<1x128xf32>, vector<1x128xf32>, vector<6x128xf32> -> vector<8x128xf32>
      %c0_14 = arith.constant 0 : index
      %c0_15 = arith.constant 0 : index
      %25 = vector.load %arg6[%c0_14, %c0_15] : memref<8x128xf32, #tpu.memory_space<vmem>>, vector<8x128xf32>
      tpu.vector_store %arg6[%c0_14, %c0_15], %24 {strides = array<i32>} : memref<8x128xf32, #tpu.memory_space<vmem>>, vector<8x128xf32>,
    } else {
    }
    return
  }
  func.func @transform_0(%arg0: i32, %arg1: i32, %arg2: i32) -> (i32, i32) {
    %c0_i32 = arith.constant 0 : i32
    return %arg1, %arg2 : i32, i32
  }
  func.func @transform_1(%arg0: i32, %arg1: i32, %arg2: i32) -> (i32, i32) {
    %c0_i32 = arith.constant 0 : i32
    %c0_i32_0 = arith.constant 0 : i32
    return %c0_i32, %arg0 : i32, i32
  }
  func.func @transform_2(%arg0: i32, %arg1: i32, %arg2: i32) -> (i32, i32) {
    %c0_i32 = arith.constant 0 : i32
    return %arg1, %arg0 : i32, i32
  }
  func.func @transform_3(%arg0: i32, %arg1: i32, %arg2: i32) -> (i32, i32) {
    %c0_i32 = arith.constant 0 : i32
    return %arg1, %arg0 : i32, i32
  }
}

module attributes {stable_mosaic.version = 11 : i64} {
  func.func @_mm_stats_kernel(%arg0: i32, %arg1: i32, %arg2: i32, %arg3: memref<128x384xbf16, #tpu.memory_space<vmem>>, %arg4: memref<1152x128xbf16, #tpu.memory_space<vmem>>, %arg5: memref<128x128xbf16, #tpu.memory_space<vmem>>, %arg6: memref<8x128xf32, #tpu.memory_space<vmem>>, %arg7: memref<128x128xf32, #tpu.memory_space<vmem>>) attributes {dimension_semantics = [#tpu.dimension_semantics<parallel>, #tpu.dimension_semantics<parallel>, #tpu.dimension_semantics<arbitrary>], iteration_bounds = array<i64: 1, 1, 3>, scalar_prefetch = 0 : i64, scratch_operands = 1 : i64, tpu.core_type = #tpu.core_type<tc>, window_params = [{transform_indices = @transform_0, window_bounds = array<i64: 128, 384>}, {transform_indices = @transform_1, window_bounds = array<i64: 1152, 128>}, {transform_indices = @transform_2, window_bounds = array<i64: 128, 128>}, {transform_indices = @transform_3, window_bounds = array<i64: 8, 128>}]} {
    %c384_i32 = arith.constant 384 : i32
    %0 = arith.muli %arg2, %c384_i32 : i32
    %1 = tpu.assume_multiple %0, 384 : i32
    %c0 = arith.constant 0 : index
    %c0_0 = arith.constant 0 : index
    %2 = vector.load %arg3[%c0, %c0_0] : memref<128x384xbf16, #tpu.memory_space<vmem>>, vector<128x384xbf16>
    %3 = arith.index_cast %1 : i32 to index
    %c0_1 = arith.constant 0 : index
    %4 = vector.load %arg4[%3, %c0_1] : memref<1152x128xbf16, #tpu.memory_space<vmem>>, vector<384x128xbf16>
    %cst = arith.constant dense<0.000000e+00> : vector<128x128xf32>
    %5 = tpu.matmul %2, %4, %cst {dimension_numbers = #tpu.dot_dimension_numbers<[1], [0], [0], [1], [0, 0, 1, 1], [], []>} : vector<128x384xbf16>, vector<384x128xbf16>, vector<128x128xf32> -> vector<128x128xf32>
    %c0_i32 = arith.constant 0 : i32
    %6 = arith.cmpi eq, %arg2, %c0_i32 : i32
    %7 = arith.extui %6 : i1 to i32
    %c0_i32_2 = arith.constant 0 : i32
    %8 = arith.cmpi ne, %7, %c0_i32_2 : i32
    scf.if %8 {
      %c0_6 = arith.constant 0 : index
      %c0_7 = arith.constant 0 : index
      %15 = vector.load %arg7[%c0_6, %c0_7] : memref<128x128xf32, #tpu.memory_space<vmem>>, vector<128x128xf32>
      tpu.vector_store %arg7[%c0_6, %c0_7], %5 {strides = array<i32>} : memref<128x128xf32, #tpu.memory_space<vmem>>, vector<128x128xf32>,
    } else {
    }
    %c0_i32_3 = arith.constant 0 : i32
    %9 = arith.cmpi sgt, %arg2, %c0_i32_3 : i32
    %10 = arith.extui %9 : i1 to i32
    %c0_i32_4 = arith.constant 0 : i32
    %11 = arith.cmpi ne, %10, %c0_i32_4 : i32
    scf.if %11 {
      %c0_6 = arith.constant 0 : index
      %c0_7 = arith.constant 0 : index
      %15 = vector.load %arg7[%c0_6, %c0_7] : memref<128x128xf32, #tpu.memory_space<vmem>>, vector<128x128xf32>
      %16 = arith.addf %15, %5 : vector<128x128xf32>
      %c0_8 = arith.constant 0 : index
      %c0_9 = arith.constant 0 : index
      %17 = vector.load %arg7[%c0_8, %c0_9] : memref<128x128xf32, #tpu.memory_space<vmem>>, vector<128x128xf32>
      tpu.vector_store %arg7[%c0_8, %c0_9], %16 {strides = array<i32>} : memref<128x128xf32, #tpu.memory_space<vmem>>, vector<128x128xf32>,
    } else {
    }
    %c2_i32 = arith.constant 2 : i32
    %12 = arith.cmpi eq, %arg2, %c2_i32 : i32
    %13 = arith.extui %12 : i1 to i32
    %c0_i32_5 = arith.constant 0 : i32
    %14 = arith.cmpi ne, %13, %c0_i32_5 : i32
    scf.if %14 {
      %c0_6 = arith.constant 0 : index
      %c0_7 = arith.constant 0 : index
      %15 = vector.load %arg7[%c0_6, %c0_7] : memref<128x128xf32, #tpu.memory_space<vmem>>, vector<128x128xf32>
      %16 = arith.truncf %15 : vector<128x128xf32> to vector<128x128xbf16>
      %c0_8 = arith.constant 0 : index
      %c0_9 = arith.constant 0 : index
      %17 = vector.load %arg5[%c0_8, %c0_9] : memref<128x128xbf16, #tpu.memory_space<vmem>>, vector<128x128xbf16>
      tpu.vector_store %arg5[%c0_8, %c0_9], %16 {strides = array<i32>} : memref<128x128xbf16, #tpu.memory_space<vmem>>, vector<128x128xbf16>,
      %cst_10 = arith.constant dense<0.000000e+00> : vector<128xf32>
      %18 = vector.multi_reduction <add>, %15, %cst_10 [0] : vector<128x128xf32> to vector<128xf32>
      %19 = vector.shape_cast %18 : vector<128xf32> to vector<1x128xf32>
      %20 = arith.mulf %15, %15 : vector<128x128xf32>
      %cst_11 = arith.constant dense<0.000000e+00> : vector<128xf32>
      %21 = vector.multi_reduction <add>, %20, %cst_11 [0] : vector<128x128xf32> to vector<128xf32>
      %22 = vector.shape_cast %21 : vector<128xf32> to vector<1x128xf32>
      %cst_12 = arith.constant 0.000000e+00 : f32
      %23 = vector.broadcast %cst_12 : f32 to vector<6x128xf32>
      %24 = tpu.concatenate %19, %22, %23 in 0 : vector<1x128xf32>, vector<1x128xf32>, vector<6x128xf32> -> vector<8x128xf32>
      %c0_13 = arith.constant 0 : index
      %c0_14 = arith.constant 0 : index
      %25 = vector.load %arg6[%c0_13, %c0_14] : memref<8x128xf32, #tpu.memory_space<vmem>>, vector<8x128xf32>
      tpu.vector_store %arg6[%c0_13, %c0_14], %24 {strides = array<i32>} : memref<8x128xf32, #tpu.memory_space<vmem>>, vector<8x128xf32>,
    } else {
    }
    return
  }
  func.func @transform_0(%arg0: i32, %arg1: i32, %arg2: i32) -> (i32, i32) {
    %c0_i32 = arith.constant 0 : i32
    return %arg1, %arg2 : i32, i32
  }
  func.func @transform_1(%arg0: i32, %arg1: i32, %arg2: i32) -> (i32, i32) {
    %c0_i32 = arith.constant 0 : i32
    %c0_i32_0 = arith.constant 0 : i32
    return %c0_i32, %arg0 : i32, i32
  }
  func.func @transform_2(%arg0: i32, %arg1: i32, %arg2: i32) -> (i32, i32) {
    %c0_i32 = arith.constant 0 : i32
    return %arg1, %arg0 : i32, i32
  }
  func.func @transform_3(%arg0: i32, %arg1: i32, %arg2: i32) -> (i32, i32) {
    %c0_i32 = arith.constant 0 : i32
    return %arg1, %arg0 : i32, i32
  }
}

module attributes {stable_mosaic.version = 11 : i64} {
  func.func @_bn_add_relu_kernel(%arg0: i32, %arg1: memref<128x128xbf16, #tpu.memory_space<vmem>>, %arg2: memref<1x128xf32, #tpu.memory_space<vmem>>, %arg3: memref<1x128xf32, #tpu.memory_space<vmem>>, %arg4: memref<128x128xbf16, #tpu.memory_space<vmem>>, %arg5: memref<128x128xbf16, #tpu.memory_space<vmem>>) attributes {dimension_semantics = [#tpu.dimension_semantics<parallel>], iteration_bounds = array<i64: 1>, scalar_prefetch = 0 : i64, scratch_operands = 0 : i64, tpu.core_type = #tpu.core_type<tc>, window_params = [{transform_indices = @transform_0, window_bounds = array<i64: 128, 128>}, {pipeline_mode = #tpu.pipeline_mode<synchronous>, transform_indices = @transform_1, window_bounds = array<i64: 1, 128>}, {pipeline_mode = #tpu.pipeline_mode<synchronous>, transform_indices = @transform_2, window_bounds = array<i64: 1, 128>}, {transform_indices = @transform_3, window_bounds = array<i64: 128, 128>}, {transform_indices = @transform_4, window_bounds = array<i64: 128, 128>}]} {
    %c0 = arith.constant 0 : index
    %c0_0 = arith.constant 0 : index
    %0 = vector.load %arg1[%c0, %c0_0] : memref<128x128xbf16, #tpu.memory_space<vmem>>, vector<128x128xbf16>
    %1 = arith.extf %0 : vector<128x128xbf16> to vector<128x128xf32>
    %c0_1 = arith.constant 0 : index
    %c0_2 = arith.constant 0 : index
    %2 = vector.load %arg2[%c0_1, %c0_2] : memref<1x128xf32, #tpu.memory_space<vmem>>, vector<1x128xf32>
    %3 = vector.broadcast %2 : vector<1x128xf32> to vector<128x128xf32>
    %4 = arith.mulf %1, %3 : vector<128x128xf32>
    %c0_3 = arith.constant 0 : index
    %c0_4 = arith.constant 0 : index
    %5 = vector.load %arg3[%c0_3, %c0_4] : memref<1x128xf32, #tpu.memory_space<vmem>>, vector<1x128xf32>
    %6 = vector.broadcast %5 : vector<1x128xf32> to vector<128x128xf32>
    %7 = arith.addf %4, %6 : vector<128x128xf32>
    %c0_5 = arith.constant 0 : index
    %c0_6 = arith.constant 0 : index
    %8 = vector.load %arg4[%c0_5, %c0_6] : memref<128x128xbf16, #tpu.memory_space<vmem>>, vector<128x128xbf16>
    %9 = arith.extf %8 : vector<128x128xbf16> to vector<128x128xf32>
    %10 = arith.addf %7, %9 : vector<128x128xf32>
    %cst = arith.constant 0.000000e+00 : f32
    %11 = vector.broadcast %cst : f32 to vector<128x128xf32>
    %12 = arith.maximumf %10, %11 : vector<128x128xf32>
    %13 = arith.truncf %12 : vector<128x128xf32> to vector<128x128xbf16>
    %c0_7 = arith.constant 0 : index
    %c0_8 = arith.constant 0 : index
    %14 = vector.load %arg5[%c0_7, %c0_8] : memref<128x128xbf16, #tpu.memory_space<vmem>>, vector<128x128xbf16>
    tpu.vector_store %arg5[%c0_7, %c0_8], %13 {strides = array<i32>} : memref<128x128xbf16, #tpu.memory_space<vmem>>, vector<128x128xbf16>,
    return
  }
  func.func @transform_0(%arg0: i32) -> (i32, i32) {
    %c0_i32 = arith.constant 0 : i32
    %c0_i32_0 = arith.constant 0 : i32
    return %arg0, %c0_i32 : i32, i32
  }
  func.func @transform_1(%arg0: i32) -> (i32, i32) {
    %c0_i32 = arith.constant 0 : i32
    %c0_i32_0 = arith.constant 0 : i32
    %c0_i32_1 = arith.constant 0 : i32
    return %c0_i32, %c0_i32_0 : i32, i32
  }
  func.func @transform_2(%arg0: i32) -> (i32, i32) {
    %c0_i32 = arith.constant 0 : i32
    %c0_i32_0 = arith.constant 0 : i32
    %c0_i32_1 = arith.constant 0 : i32
    return %c0_i32, %c0_i32_0 : i32, i32
  }
  func.func @transform_3(%arg0: i32) -> (i32, i32) {
    %c0_i32 = arith.constant 0 : i32
    %c0_i32_0 = arith.constant 0 : i32
    return %arg0, %c0_i32 : i32, i32
  }
  func.func @transform_4(%arg0: i32) -> (i32, i32) {
    %c0_i32 = arith.constant 0 : i32
    %c0_i32_0 = arith.constant 0 : i32
    return %arg0, %c0_i32 : i32, i32
  }
}

</mosaic_0001>

<bundles_post_ra>
// kernel: conv2n_block_forward.11
= control target key start
LH: loop header
LB: loop body
LE: loop exit
PB: predicated region body
PF: predicated region fallthrough
CT: control target
= control target key end

     0   :  { %s422_s0 = inlined_call_operand.vmem [shape: bf16[128,128], index: 0, kind: input, shape index: {}]   ;;  %s423_s1 = inlined_call_operand.vmem [shape: f32[1,128], index: 1, kind: input, shape index: {}]   ;;  %s424_s2 = inlined_call_operand.vmem [shape: f32[1,128], index: 2, kind: input, shape index: {}]   ;;  %s425_s3 = inlined_call_operand.vmem [shape: bf16[128,128], index: 3, kind: output, shape index: {}]  }
   0x1   :  { %v227_v0 = vld [vmem:[%s422_s0] sm:$0xff]   ;;  %v298_v4 = vld [vmem:[%s422_s0 + $0x8] sm:$0xff]   ;;  %v299_v5 = vld [vmem:[%s422_s0 + $0x10] sm:$0xff]  }
   0x2   :  { %v338_v1 = vld [vmem:[%s423_s1] ss:$0 sm:$0xff]  ;;  %v228_v2 = vunpack.c.l.bf16 %v227_v0  ;;  %v229_v3 = vunpack.c.h.bf16 %v227_v0  ;;  %v300_v6 = vld [vmem:[%s422_s0 + $0x18] sm:$0xff]   ;;  %v232_v8 = vunpack.c.l.bf16 %v298_v4  ;;  %v233_v9 = vunpack.c.h.bf16 %v298_v4  ;;  %v302_v33 = vld [vmem:[%s422_s0 + $0x28] sm:$0xff]  }
   0x3   :  { %v352_v7 = vld [vmem:[%s424_s2] ss:$0 sm:$0xff]  ;;  %v236_v10 = vunpack.c.l.bf16 %v299_v5  ;;  %v237_v11 = vunpack.c.h.bf16 %v299_v5  ;;  %v240_v14 = vunpack.c.l.bf16 %v300_v6  ;;  %v241_v15 = vunpack.c.h.bf16 %v300_v6  ;;  %v303_v38 = vld [vmem:[%s422_s0 + $0x30] sm:$0xff]   ;;  %v304_v43 = vld [vmem:[%s422_s0 + $0x38] sm:$0xff]  }
   0x4   :  { %v53_v12 = vmul.f32 %v228_v2, %v338_v1  ;;  %v54_v13 = vmul.f32 %v229_v3, %v338_v1  ;;  %v55_v16 = vmul.f32 %v232_v8, %v338_v1  ;;  %v56_v17 = vmul.f32 %v233_v9, %v338_v1  ;;  %v301_v28 = vld [vmem:[%s422_s0 + $0x20] sm:$0xff]  }
   0x5   :  { %v57_v18 = vmul.f32 %v236_v10, %v338_v1  ;;  %v58_v19 = vmul.f32 %v237_v11, %v338_v1  ;;  %v59_v22 = vmul.f32 %v240_v14, %v338_v1  ;;  %v60_v23 = vmul.f32 %v241_v15, %v338_v1 }
   0x6   :  { %v76_v20 = vadd.f32 %v352_v7, %v53_v12  ;;  %v77_v21 = vadd.f32 %v352_v7, %v54_v13  ;;  %v78_v24 = vadd.f32 %v352_v7, %v55_v16  ;;  %v79_v25 = vadd.f32 %v352_v7, %v56_v17 }
   0x7   :  { %v80_v26 = vadd.f32 %v352_v7, %v57_v18  ;;  %v81_v27 = vadd.f32 %v352_v7, %v58_v19  ;;  %v82_v31 = vadd.f32 %v352_v7, %v59_v22  ;;  %v83_v32 = vadd.f32 %v352_v7, %v60_v23 }
   0x8   :  { %v92_v29 = vmax.f32 %v76_v20, 0.0  ;;  %v93_v30 = vmax.f32 %v77_v21, 0.0  ;;  %v94_v34 = vmax.f32 %v78_v24, 0.0  ;;  %v95_v35 = vmax.f32 %v79_v25, 0.0 }
   0x9   :  { %v96_v36 = vmax.f32 %v80_v26, 0.0  ;;  %v97_v37 = vmax.f32 %v81_v27, 0.0  ;;  %v98_v40 = vmax.f32 %v82_v31, 0.0  ;;  %v99_v41 = vmax.f32 %v83_v32, 0.0 }
   0xa   :  { %v261_v39 = vpack.c.bf16 %v93_v30, %v92_v29  ;;  %v244_v42 = vunpack.c.l.bf16 %v301_v28  ;;  %v266_v44 = vpack.c.bf16 %v95_v35, %v94_v34  ;;  %v245_v46 = vunpack.c.h.bf16 %v301_v28 }
   0xb   :  { %v271_v45 = vpack.c.bf16 %v97_v37, %v96_v36  ;;  %v248_v47 = vunpack.c.l.bf16 %v302_v33  ;;  %v276_v48 = vpack.c.bf16 %v99_v41, %v98_v40  ;;  %v249_v50 = vunpack.c.h.bf16 %v302_v33 }
   0xc   :  { %262 = vst [vmem:[%s425_s3] sm:$0xff] %v261_v39   ;;  %v61_v49 = vmul.f32 %v244_v42, %v338_v1  ;;  %v252_v51 = vunpack.c.l.bf16 %v303_v38  ;;  %305 = vst [vmem:[%s425_s3 + $0x8] sm:$0xff] %v266_v44   ;;  %v62_v52 = vmul.f32 %v245_v46, %v338_v1  ;;  %v253_v54 = vunpack.c.h.bf16 %v303_v38 }
   0xd   :  { %306 = vst [vmem:[%s425_s3 + $0x10] sm:$0xff] %v271_v45   ;;  %v63_v53 = vmul.f32 %v248_v47, %v338_v1  ;;  %v256_v55 = vunpack.c.l.bf16 %v304_v43  ;;  %307 = vst [vmem:[%s425_s3 + $0x18] sm:$0xff] %v276_v48   ;;  %v64_v57 = vmul.f32 %v249_v50, %v338_v1  ;;  %v257_v59 = vunpack.c.h.bf16 %v304_v43 }
   0xe   :  { %v84_v56 = vadd.f32 %v352_v7, %v61_v49  ;;  %v65_v58 = vmul.f32 %v252_v51, %v338_v1  ;;  %v85_v60 = vadd.f32 %v352_v7, %v62_v52  ;;  %v66_v62 = vmul.f32 %v253_v54, %v338_v1 }
   0xf   :  { %v86_v61 = vadd.f32 %v352_v7, %v63_v53  ;;  %v67_v63 = vmul.f32 %v256_v55, %v338_v1  ;;  %v87_v2 = vadd.f32 %v352_v7, %v64_v57  ;;  %v68_v4 = vmul.f32 %v257_v59, %v338_v1 }
  0x10   :  { %v100_v0 = vmax.f32 %v84_v56, 0.0  ;;  %v88_v3 = vadd.f32 %v352_v7, %v65_v58  ;;  %v101_v5 = vmax.f32 %v85_v60, 0.0  ;;  %v89_v8 = vadd.f32 %v352_v7, %v66_v62 }
  0x11   :  { %v102_v6 = vmax.f32 %v86_v61, 0.0  ;;  %v90_v9 = vadd.f32 %v352_v7, %v67_v63  ;;  %v103_v10 = vmax.f32 %v87_v2, 0.0  ;;  %v91_v12 = vadd.f32 %v352_v7, %v68_v4 }
  0x12   :  { %v104_v11 = vmax.f32 %v88_v3, 0.0  ;;  %v281_v13 = vpack.c.bf16 %v101_v5, %v100_v0  ;;  %v105_v14 = vmax.f32 %v89_v8, 0.0 }
  0x13   :  { %v106_v15 = vmax.f32 %v90_v9, 0.0  ;;  %v286_v16 = vpack.c.bf16 %v103_v10, %v102_v6  ;;  %v107_v17 = vmax.f32 %v91_v12, 0.0 }
  0x14   :  { %308 = vst [vmem:[%s425_s3 + $0x20] sm:$0xff] %v281_v13   ;;  %v291_v1 = vpack.c.bf16 %v105_v14, %v104_v11 }
  0x15   :  { %309 = vst [vmem:[%s425_s3 + $0x28] sm:$0xff] %v286_v16   ;;  %v296_v18 = vpack.c.bf16 %v107_v17, %v106_v15 }
  0x16   :  { %310 = vst [vmem:[%s425_s3 + $0x30] sm:$0xff] %v291_v1  }
  0x17   :  { %311 = vst [vmem:[%s425_s3 + $0x38] sm:$0xff] %v296_v18  }

// kernel: conv2n_block_forward.10
= control target key start
LH: loop header
LB: loop body
LE: loop exit
PB: predicated region body
PF: predicated region fallthrough
CT: control target
= control target key end

     0   :  { %vm473_vm0 = vcmask 1040384   ;;  %vm475_vm1 = vcmask 1041408   ;;  %s758_s1 = inlined_call_operand.vmem [shape: bf16[128,128], index: 1, kind: input, shape index: {}]   ;;  %s759_s0 = inlined_call_operand.vmem [shape: bf16[128,128], index: 0, kind: input, shape index: {}]   ;;  %s760_s2 = inlined_call_operand.vmem [shape: bf16[128,128], index: 2, kind: output, shape index: {0}]   ;;  %s761_s3 = inlined_call_operand.vmem [shape: f32[8,128], index: 3, kind: output, shape index: {1}]  }
   0x1   :  { %v647_v0 = vld [vmem:[%s758_s1] sm:$0xff]   ;;  %v648_v1 = vld [vmem:[%s758_s1 + $0x8] sm:$0xff]   ;;  %v649_v2 = vld [vmem:[%s758_s1 + $0x10] sm:$0xff]  }
   0x2   :  { %599 = vmatprep.subr.bf16.mxu0 %v647_v0  ;;  %631 = vmatprep.subr.bf16.mxu1 %v647_v0  ;;  %v650_v3 = vld [vmem:[%s758_s1 + $0x18] sm:$0xff]   ;;  %v655_v4 = vld [vmem:[%s759_s0] sm:$0xff]   ;;  %v652_v7 = vld [vmem:[%s758_s1 + $0x28] sm:$0xff]  }
   0x3   :  { %600 = vmatpush3.bf16.msra.mxu0 %v647_v0  ;;  %639 = vmatpush3.bf16.msra.mxu1 %v647_v0  ;;  %v651_v5 = vld [vmem:[%s758_s1 + $0x20] sm:$0xff]   ;;  %v653_v8 = vld [vmem:[%s758_s1 + $0x30] sm:$0xff]   ;;  %v654_v9 = vld [vmem:[%s758_s1 + $0x38] sm:$0xff]  }
   0x4   :  { %601 = vmatprep.subr.bf16.mxu0 %v648_v1  ;;  %632 = vmatprep.subr.bf16.mxu1 %v648_v1  ;;  %v659_v6 = vld [vmem:[%s759_s0 + $0x20] sm:$0xff]   ;;  %v656_v10 = vld [vmem:[%s759_s0 + $0x8] sm:$0xff]   ;;  %v657_v12 = vld [vmem:[%s759_s0 + $0x10] sm:$0xff]  }
   0x5   :  { %615 = vmatprep.mubr.bf16.mxu0 %v655_v4  ;;  %623 = vmatprep.mubr.bf16.mxu1 %v659_v6  ;;  %v660_v11 = vld [vmem:[%s759_s0 + $0x28] sm:$0xff]   ;;  %v661_v13 = vld [vmem:[%s759_s0 + $0x30] sm:$0xff]   ;;  %v658_v14 = vld [vmem:[%s759_s0 + $0x18] sm:$0xff]  }
   0x6   :  { %v662_v15 = vld [vmem:[%s759_s0 + $0x38] sm:$0xff]  }
   0x7   :  { %602 = vmatpush3.bf16.msra.mxu0 %v648_v1  ;;  %640 = vmatpush3.bf16.msra.mxu1 %v648_v1 }
   0x8   :  { %603 = vmatprep.subr.bf16.mxu0 %v649_v2  ;;  %633 = vmatprep.subr.bf16.mxu1 %v649_v2 }
   0xb   :  { %604 = vmatpush3.bf16.msra.mxu0 %v649_v2  ;;  %641 = vmatpush3.bf16.msra.mxu1 %v649_v2 }
   0xc   :  { %605 = vmatprep.subr.bf16.mxu0 %v650_v3  ;;  %634 = vmatprep.subr.bf16.mxu1 %v650_v3 }
   0xf   :  { %606 = vmatpush3.bf16.msra.mxu0 %v650_v3  ;;  %642 = vmatpush3.bf16.msra.mxu1 %v650_v3 }
  0x10   :  { %607 = vmatprep.subr.bf16.mxu0 %v651_v5  ;;  %635 = vmatprep.subr.bf16.mxu1 %v651_v5 }
  0x13   :  { %608 = vmatpush3.bf16.msra.mxu0 %v651_v5  ;;  %643 = vmatpush3.bf16.msra.mxu1 %v651_v5 }
  0x14   :  { %609 = vmatprep.subr.bf16.mxu0 %v652_v7  ;;  %636 = vmatprep.subr.bf16.mxu1 %v652_v7 }
  0x17   :  { %610 = vmatpush3.bf16.msra.mxu0 %v652_v7  ;;  %644 = vmatpush3.bf16.msra.mxu1 %v652_v7 }
  0x18   :  { %611 = vmatprep.subr.bf16.mxu0 %v653_v8  ;;  %637 = vmatprep.subr.bf16.mxu1 %v653_v8 }
  0x1b   :  { %612 = vmatpush3.bf16.msra.mxu0 %v653_v8  ;;  %645 = vmatpush3.bf16.msra.mxu1 %v653_v8 }
  0x1c   :  { %613 = vmatprep.subr.bf16.mxu0 %v654_v9  ;;  %638 = vmatprep.subr.bf16.mxu1 %v654_v9 }
  0x1f   :  { %614 = vmatpush3.bf16.msra.mxu0 %v654_v9  ;;  %646 = vmatpush3.bf16.msra.mxu1 %v654_v9 }
  0x22   :  { %616 = vmatmul.mubr.bf16.vlgmr.msra.gmra.mrb[0].mxu0 %v656_v10  ;;  %624 = vmatmul.mubr.bf16.vlgmr.msra.gmra.mrb[0].mxu1 %v660_v11 }
  0x23   :  { %619 = vmatprep.mubr.bf16.mxu0 %v657_v12  ;;  %627 = vmatprep.mubr.bf16.mxu1 %v661_v13 }
  0x2a   :  { %620 = vmatmul.mubr.bf16.gmra.mrb[4].mxu0 %v658_v14  ;;  %628 = vmatmul.mubr.bf16.gmra.mrb[4].mxu1 %v662_v15 }
  0xf5   :  { %v617_v16 = vpop.f32.mrb[0].mxu0  ;;  %v625_v17 = vpop.f32.mrb[0].mxu1 }
  0xf6   :  { %v181_v18 = vpop.f32.mrb[1].mxu0  ;;  %v213_v19 = vpop.f32.mrb[1].mxu1  ;;  %v438_v31 = vmul.f32 %v617_v16, %v617_v16  ;;  %v446_v3 = vmul.f32 %v625_v17, %v625_v17 }
  0xf7   :  { %v618_v20 = vpop.f32.mrb[2].mxu0  ;;  %v626_v21 = vpop.f32.mrb[2].mxu1  ;;  %v436_v22 = vmul.f32 %v181_v18, %v181_v18  ;;  %v444_v61 = vmul.f32 %v213_v19, %v213_v19 }
  0xf8   :  { %v544_v23 = vpack.c.bf16 %v618_v20, %v617_v16  ;;  %v184_v24 = vpop.f32.mrb[3].mxu0  ;;  %v564_v25 = vpack.c.bf16 %v626_v21, %v625_v17  ;;  %v216_v26 = vpop.f32.mrb[3].mxu1  ;;  %v439_v34 = vmul.f32 %v618_v20, %v618_v20  ;;  %v447_v6 = vmul.f32 %v626_v21, %v626_v21 }
  0xf9   :  { %v539_v27 = vpack.c.bf16 %v184_v24, %v181_v18  ;;  %v415_v28 = vadd.f32 %v184_v24, %v181_v18  ;;  %v437_v29 = vmul.f32 %v184_v24, %v184_v24  ;;  %v559_v30 = vpack.c.bf16 %v216_v26, %v213_v19 }
  0xfa   :  { %576 = vst [vmem:[%s760_s2 + $0x8] sm:$0xff] %v544_v23   ;;  %580 = vst [vmem:[%s760_s2 + $0x28] sm:$0xff] %v564_v25   ;;  %v445_v2 = vmul.f32 %v216_v26, %v216_v26 }
  0xfb   :  { %540 = vst [vmem:[%s760_s2] sm:$0xff] %v539_v27   ;;  %v416_v32 = vadd.f32 %v617_v16, %v415_v28  ;;  %v452_v33 = vadd.f32 %v437_v29, %v436_v22  ;;  %579 = vst [vmem:[%s760_s2 + $0x20] sm:$0xff] %v559_v30  }
  0xfd   :  { %v453_v35 = vadd.f32 %v452_v33, %v438_v31  ;;  %v621_v36 = vpop.f32.mrb[4].mxu0  ;;  %v417_v37 = vadd.f32 %v618_v20, %v416_v32  ;;  %v629_v38 = vpop.f32.mrb[4].mxu1 }
  0xfe   :  { %v197_v39 = vpop.f32.mrb[5].mxu0  ;;  %v229_v40 = vpop.f32.mrb[5].mxu1  ;;  %v442_v55 = vmul.f32 %v621_v36, %v621_v36  ;;  %v450_v15 = vmul.f32 %v629_v38, %v629_v38 }
  0xff   :  { %v418_v41 = vadd.f32 %v417_v37, %v197_v39  ;;  %v440_v42 = vmul.f32 %v197_v39, %v197_v39  ;;  %v454_v43 = vadd.f32 %v453_v35, %v439_v34  ;;  %v622_v44 = vpop.f32.mrb[6].mxu0  ;;  %v630_v45 = vpop.f32.mrb[6].mxu1  ;;  %v448_v9 = vmul.f32 %v229_v40, %v229_v40 }
 0x100   :  { %v554_v46 = vpack.c.bf16 %v622_v44, %v621_v36  ;;  %v200_v47 = vpop.f32.mrb[7].mxu0  ;;  %v574_v48 = vpack.c.bf16 %v630_v45, %v629_v38  ;;  %v232_v49 = vpop.f32.mrb[7].mxu1  ;;  %v443_v58 = vmul.f32 %v622_v44, %v622_v44 }
 0x101   :  { %v455_v50 = vadd.f32 %v454_v43, %v440_v42  ;;  %v549_v51 = vpack.c.bf16 %v200_v47, %v197_v39  ;;  %v419_v52 = vadd.f32 %v418_v41, %v200_v47  ;;  %v441_v53 = vmul.f32 %v200_v47, %v200_v47 }
 0x102   :  { %578 = vst [vmem:[%s760_s2 + $0x18] sm:$0xff] %v554_v46   ;;  %582 = vst [vmem:[%s760_s2 + $0x38] sm:$0xff] %v574_v48   ;;  %v569_v54 = vpack.c.bf16 %v232_v49, %v229_v40  ;;  %v449_v14 = vmul.f32 %v232_v49, %v232_v49 }
 0x103   :  { %577 = vst [vmem:[%s760_s2 + $0x10] sm:$0xff] %v549_v51   ;;  %v420_v56 = vadd.f32 %v621_v36, %v419_v52  ;;  %v456_v57 = vadd.f32 %v455_v50, %v441_v53 }
 0x104   :  { %581 = vst [vmem:[%s760_s2 + $0x30] sm:$0xff] %v569_v54  }
 0x105   :  { %v457_v59 = vadd.f32 %v456_v57, %v442_v55  ;;  %v421_v60 = vadd.f32 %v622_v44, %v420_v56 }
 0x107   :  { %v422_v62 = vadd.f32 %v421_v60, %v213_v19  ;;  %v458_v63 = vadd.f32 %v457_v59, %v443_v58  ;;  %v451_v19 = vmul.f32 %v630_v45, %v630_v45 }
 0x109   :  { %v459_v0 = vadd.f32 %v458_v63, %v444_v61  ;;  %v423_v1 = vadd.f32 %v422_v62, %v216_v26 }
 0x10b   :  { %v424_v4 = vadd.f32 %v625_v17, %v423_v1  ;;  %v460_v5 = vadd.f32 %v459_v0, %v445_v2 }
 0x10d   :  { %v461_v7 = vadd.f32 %v460_v5, %v446_v3  ;;  %v425_v8 = vadd.f32 %v626_v21, %v424_v4 }
 0x10f   :  { %v426_v10 = vadd.f32 %v425_v8, %v229_v40  ;;  %v462_v11 = vadd.f32 %v461_v7, %v447_v6 }
 0x111   :  { %v463_v12 = vadd.f32 %v462_v11, %v448_v9  ;;  %v427_v13 = vadd.f32 %v426_v10, %v232_v49 }
 0x113   :  { %v428_v16 = vadd.f32 %v629_v38, %v427_v13  ;;  %v464_v18 = vadd.f32 %v463_v12, %v449_v14 }
 0x115   :  { %v429_v20 = vadd.f32 %v630_v45, %v428_v16  ;;  %v465_v22 = vadd.f32 %v464_v18, %v450_v15 }
 0x117   :  { %v430_v23 = vrot.slane %v429_v20, 4  ;;  %v466_v24 = vadd.f32 %v465_v22, %v451_v19 }
 0x119   :  { %v431_v25 = vadd.f32 %v430_v23, %v429_v20  ;;  %v467_v17 = vrot.slane %v466_v24, 4 }
 0x11b   :  { %v432_v26 = vrot.slane %v431_v25, 2  ;;  %v468_v27 = vadd.f32 %v467_v17, %v466_v24 }
 0x11d   :  { %v433_v28 = vadd.f32 %v432_v26, %v431_v25  ;;  %v469_v21 = vrot.slane %v468_v27, 2 }
 0x11f   :  { %v434_v29 = vrot.slane %v433_v28, 1  ;;  %v470_v30 = vadd.f32 %v469_v21, %v468_v27 }
 0x121   :  { %v471_v31 = vrot.slane %v470_v30, 1  ;;  %v435_v32 = vadd.f32 %v434_v29, %v433_v28 }
 0x123   :  { %v472_v33 = vadd.f32 %v471_v31, %v470_v30 }
 0x125   :  { %v474_v34 = vsel %vm473_vm0, %v435_v32, %v472_v33 }
 0x126   :  { %v476_v35 = vsel %vm475_vm1, %v474_v34, 0.0 }
 0x127   :  { %477 = vst [vmem:[%s761_s3] sm:$0xff] %v476_v35 }

// kernel: conv2n_block_forward.15
= control target key start
LH: loop header
LB: loop body
LE: loop exit
PB: predicated region body
PF: predicated region fallthrough
CT: control target
= control target key end

     0   :  { %s541_s0 = inlined_call_operand.vmem [shape: bf16[128,128], index: 0, kind: input, shape index: {}]   ;;  %s542_s1 = inlined_call_operand.vmem [shape: f32[1,128], index: 1, kind: input, shape index: {}]   ;;  %s543_s2 = inlined_call_operand.vmem [shape: f32[1,128], index: 2, kind: input, shape index: {}]   ;;  %s544_s3 = inlined_call_operand.vmem [shape: bf16[128,128], index: 3, kind: input, shape index: {}]   ;;  %s545_s4 = inlined_call_operand.vmem [shape: bf16[128,128], index: 4, kind: output, shape index: {}]  }
   0x1   :  { %v278_v0 = vld [vmem:[%s541_s0] sm:$0xff]   ;;  %v381_v5 = vld [vmem:[%s541_s0 + $0x8] sm:$0xff]   ;;  %v382_v12 = vld [vmem:[%s541_s0 + $0x10] sm:$0xff]  }
   0x2   :  { %v433_v1 = vld [vmem:[%s542_s1] ss:$0 sm:$0xff]  ;;  %v279_v2 = vunpack.c.l.bf16 %v278_v0  ;;  %v280_v3 = vunpack.c.h.bf16 %v278_v0  ;;  %v388_v6 = vld [vmem:[%s544_s3 + $0x8] sm:$0xff]   ;;  %v283_v10 = vunpack.c.l.bf16 %v381_v5  ;;  %v284_v11 = vunpack.c.h.bf16 %v381_v5  ;;  %v389_v13 = vld [vmem:[%s544_s3 + $0x10] sm:$0xff]  }
   0x3   :  { %v310_v4 = vld [vmem:[%s544_s3] sm:$0xff]   ;;  %v315_v16 = vunpack.c.l.bf16 %v388_v6  ;;  %v316_v17 = vunpack.c.h.bf16 %v388_v6  ;;  %v287_v20 = vunpack.c.l.bf16 %v382_v12  ;;  %v288_v21 = vunpack.c.h.bf16 %v382_v12  ;;  %v383_v22 = vld [vmem:[%s541_s0 + $0x18] sm:$0xff]   ;;  %v385_v54 = vld [vmem:[%s541_s0 + $0x28] sm:$0xff]  }
   0x4   :  { %v447_v7 = vld [vmem:[%s543_s2] ss:$0 sm:$0xff]  ;;  %v311_v8 = vunpack.c.l.bf16 %v310_v4  ;;  %v312_v9 = vunpack.c.h.bf16 %v310_v4  ;;  %v56_v14 = vmul.f32 %v279_v2, %v433_v1  ;;  %v57_v15 = vmul.f32 %v280_v3, %v433_v1  ;;  %v390_v39 = vld [vmem:[%s544_s3 + $0x18] sm:$0xff]   ;;  %v392_v63 = vld [vmem:[%s544_s3 + $0x28] sm:$0xff]  }
   0x5   :  { %v58_v18 = vmul.f32 %v283_v10, %v433_v1  ;;  %v59_v19 = vmul.f32 %v284_v11, %v433_v1  ;;  %v319_v25 = vunpack.c.l.bf16 %v389_v13  ;;  %v320_v26 = vunpack.c.h.bf16 %v389_v13  ;;  %v384_v48 = vld [vmem:[%s541_s0 + $0x20] sm:$0xff]   ;;  %v386_v5 = vld [vmem:[%s541_s0 + $0x30] sm:$0xff]  }
   0x6   :  { %v79_v23 = vadd.f32 %v447_v7, %v56_v14  ;;  %v80_v24 = vadd.f32 %v447_v7, %v57_v15  ;;  %v60_v29 = vmul.f32 %v287_v20, %v433_v1  ;;  %v61_v30 = vmul.f32 %v288_v21, %v433_v1  ;;  %v391_v49 = vld [vmem:[%s544_s3 + $0x20] sm:$0xff]   ;;  %v393_v11 = vld [vmem:[%s544_s3 + $0x30] sm:$0xff]   ;;  %v387_v20 = vld [vmem:[%s541_s0 + $0x38] sm:$0xff]  }
   0x7   :  { %v81_v27 = vadd.f32 %v447_v7, %v58_v18  ;;  %v82_v28 = vadd.f32 %v447_v7, %v59_v19  ;;  %v291_v33 = vunpack.c.l.bf16 %v383_v22  ;;  %v292_v34 = vunpack.c.h.bf16 %v383_v22 }
   0x8   :  { %v127_v31 = vadd.f32 %v311_v8, %v79_v23  ;;  %v128_v32 = vadd.f32 %v312_v9, %v80_v24  ;;  %v83_v37 = vadd.f32 %v447_v7, %v60_v29  ;;  %v84_v38 = vadd.f32 %v447_v7, %v61_v30 }
   0x9   :  { %v129_v35 = vadd.f32 %v315_v16, %v81_v27  ;;  %v130_v36 = vadd.f32 %v316_v17, %v82_v28  ;;  %v62_v42 = vmul.f32 %v291_v33, %v433_v1  ;;  %v63_v43 = vmul.f32 %v292_v34, %v433_v1  ;;  %v394_v33 = vld [vmem:[%s544_s3 + $0x38] sm:$0xff]  }
   0xa   :  { %v143_v40 = vmax.f32 %v127_v31, 0.0  ;;  %v144_v41 = vmax.f32 %v128_v32, 0.0  ;;  %v131_v46 = vadd.f32 %v319_v25, %v83_v37  ;;  %v132_v47 = vadd.f32 %v320_v26, %v84_v38 }
   0xb   :  { %v145_v44 = vmax.f32 %v129_v35, 0.0  ;;  %v146_v45 = vmax.f32 %v130_v36, 0.0  ;;  %v85_v51 = vadd.f32 %v447_v7, %v62_v42  ;;  %v86_v52 = vadd.f32 %v447_v7, %v63_v43 }
   0xc   :  { %v344_v50 = vpack.c.bf16 %v144_v41, %v143_v40  ;;  %v323_v53 = vunpack.c.l.bf16 %v390_v39  ;;  %v147_v56 = vmax.f32 %v131_v46, 0.0  ;;  %v148_v57 = vmax.f32 %v132_v47, 0.0 }
   0xd   :  { %v349_v55 = vpack.c.bf16 %v146_v45, %v145_v44  ;;  %v324_v58 = vunpack.c.h.bf16 %v390_v39  ;;  %v295_v60 = vunpack.c.l.bf16 %v384_v48  ;;  %v296_v61 = vunpack.c.h.bf16 %v384_v48 }
   0xe   :  { %345 = vst [vmem:[%s545_s4] sm:$0xff] %v344_v50   ;;  %v133_v59 = vadd.f32 %v323_v53, %v85_v51  ;;  %v327_v62 = vunpack.c.l.bf16 %v391_v49  ;;  %v354_v0 = vpack.c.bf16 %v148_v57, %v147_v56  ;;  %v328_v3 = vunpack.c.h.bf16 %v391_v49 }
   0xf   :  { %395 = vst [vmem:[%s545_s4 + $0x8] sm:$0xff] %v349_v55   ;;  %v134_v2 = vadd.f32 %v324_v58, %v86_v52  ;;  %v299_v4 = vunpack.c.l.bf16 %v385_v54  ;;  %v64_v8 = vmul.f32 %v295_v60, %v433_v1  ;;  %v65_v9 = vmul.f32 %v296_v61, %v433_v1 }
  0x10   :  { %v149_v6 = vmax.f32 %v133_v59, 0.0  ;;  %v300_v10 = vunpack.c.h.bf16 %v385_v54  ;;  %396 = vst [vmem:[%s545_s4 + $0x10] sm:$0xff] %v354_v0   ;;  %v331_v14 = vunpack.c.l.bf16 %v392_v63  ;;  %v332_v15 = vunpack.c.h.bf16 %v392_v63 }
  0x11   :  { %v150_v12 = vmax.f32 %v134_v2, 0.0  ;;  %v66_v13 = vmul.f32 %v299_v4, %v433_v1  ;;  %v87_v16 = vadd.f32 %v447_v7, %v64_v8  ;;  %v88_v17 = vadd.f32 %v447_v7, %v65_v9 }
  0x12   :  { %v67_v18 = vmul.f32 %v300_v10, %v433_v1  ;;  %v303_v19 = vunpack.c.l.bf16 %v386_v5  ;;  %v304_v23 = vunpack.c.h.bf16 %v386_v5  ;;  %v335_v24 = vunpack.c.l.bf16 %v393_v11 }
  0x13   :  { %v359_v21 = vpack.c.bf16 %v150_v12, %v149_v6  ;;  %v89_v22 = vadd.f32 %v447_v7, %v66_v13  ;;  %v135_v25 = vadd.f32 %v327_v62, %v87_v16  ;;  %v136_v26 = vadd.f32 %v328_v3, %v88_v17 }
  0x14   :  { %v90_v27 = vadd.f32 %v447_v7, %v67_v18  ;;  %v68_v28 = vmul.f32 %v303_v19, %v433_v1  ;;  %v69_v30 = vmul.f32 %v304_v23, %v433_v1  ;;  %v336_v31 = vunpack.c.h.bf16 %v393_v11 }
  0x15   :  { %397 = vst [vmem:[%s545_s4 + $0x18] sm:$0xff] %v359_v21   ;;  %v137_v29 = vadd.f32 %v331_v14, %v89_v22  ;;  %v307_v32 = vunpack.c.l.bf16 %v387_v20  ;;  %v151_v34 = vmax.f32 %v135_v25, 0.0  ;;  %v152_v35 = vmax.f32 %v136_v26, 0.0 }
  0x16   :  { %v138_v36 = vadd.f32 %v332_v15, %v90_v27  ;;  %v91_v37 = vadd.f32 %v447_v7, %v68_v28  ;;  %v92_v39 = vadd.f32 %v447_v7, %v69_v30  ;;  %v308_v40 = vunpack.c.h.bf16 %v387_v20 }
  0x17   :  { %v153_v38 = vmax.f32 %v137_v29, 0.0  ;;  %v70_v41 = vmul.f32 %v307_v32, %v433_v1  ;;  %v364_v42 = vpack.c.bf16 %v152_v35, %v151_v34  ;;  %v339_v45 = vunpack.c.l.bf16 %v394_v33 }
  0x18   :  { %v154_v43 = vmax.f32 %v138_v36, 0.0  ;;  %v139_v44 = vadd.f32 %v335_v24, %v91_v37  ;;  %v140_v46 = vadd.f32 %v336_v31, %v92_v39  ;;  %v71_v47 = vmul.f32 %v308_v40, %v433_v1 }
  0x19   :  { %v93_v48 = vadd.f32 %v447_v7, %v70_v41  ;;  %v340_v49 = vunpack.c.h.bf16 %v394_v33  ;;  %398 = vst [vmem:[%s545_s4 + $0x20] sm:$0xff] %v364_v42  }
  0x1a   :  { %v369_v50 = vpack.c.bf16 %v154_v43, %v153_v38  ;;  %v155_v51 = vmax.f32 %v139_v44, 0.0  ;;  %v156_v52 = vmax.f32 %v140_v46, 0.0  ;;  %v94_v53 = vadd.f32 %v447_v7, %v71_v47 }
  0x1b   :  { %v141_v54 = vadd.f32 %v339_v45, %v93_v48 }
  0x1c   :  { %399 = vst [vmem:[%s545_s4 + $0x28] sm:$0xff] %v369_v50   ;;  %v374_v55 = vpack.c.bf16 %v156_v52, %v155_v51  ;;  %v142_v56 = vadd.f32 %v340_v49, %v94_v53 }
  0x1d   :  { %v157_v1 = vmax.f32 %v141_v54, 0.0 }
  0x1e   :  { %400 = vst [vmem:[%s545_s4 + $0x30] sm:$0xff] %v374_v55   ;;  %v158_v57 = vmax.f32 %v142_v56, 0.0 }
  0x20   :  { %v379_v58 = vpack.c.bf16 %v158_v57, %v157_v1 }
  0x22   :  { %401 = vst [vmem:[%s545_s4 + $0x38] sm:$0xff] %v379_v58  }

// kernel: conv2n_block_forward.12
= control target key start
LH: loop header
LB: loop body
LE: loop exit
PB: predicated region body
PF: predicated region fallthrough
CT: control target
= control target key end

     0   :  { %s1708_s12 = smov 0   ;;  %s1710_s13 = smov 0   ;;  %s1983_s0 = inlined_call_operand.vmem [shape: bf16[128,1152], index: 0, kind: input, shape index: {}]   ;;  %s1984_s1 = inlined_call_operand.vmem [shape: bf16[1152,128], index: 1, kind: input, shape index: {}]   ;;  %s1985_s2 = inlined_call_operand.vmem [shape: bf16[128,128], index: 2, kind: output, shape index: {0}]   ;;  %s1986_s3 = inlined_call_operand.vmem [shape: f32[8,128], index: 3, kind: output, shape index: {1}]  }
   0x1   :  { %s1712_s14 = smov 0   ;;  %s1714_s15 = smov 0  }
   0x2   :  { %s1716_s16 = smov 0  }
   0x3 LB: > { %s26_s17 = sadd.s32 1, %s1682_s15  ;;  %p49_p1 = scmp.ne.s32.totalorder %s1674_s13, %s1670_s12  ;;  %s1686_s16 = sphi %s1716_s16, %s14_s16   ;;  %s1682_s15 = sphi %s1714_s15, %s1990_s15   ;;  %s1678_s14 = sphi %s1712_s14, %s1989_s14   ;;  %s1674_s13 = sphi %s1710_s13, %s1988_s13   ;;  %s1670_s12 = sphi %s1708_s12, %s1987_s12  }
   0x4   : > { %p27_p0 = scmp.ge.s32.totalorder %s26_s17, 3  ;;  %p50_p2 = scmp.eq.s32.totalorder %s1686_s16, 0 }
   0x5   : > { %s42_s19 = sadd.s32 1, %s1674_s13  ;;  %p1266_p5 = scmp.ge.s32.totalorder %s1686_s16, 3 }
   0x6   : > { %s1992_s17 = smov (%p27_p0, %s26_s17), 0  ;;  %p51_p3 = por %p50_p2, %p49_p1 }
   0x7   : > { %s38_s18 = ssub.s32 %s1682_s15, %s1992_s17  ;;  %164 = sbr.rel (%p1266_p5) target bundleno = 37 (0x25), region = 20 }
   0x8   : > { %p40_p4 = scmp.eq.s32.totalorder %s38_s18, 0 }
   0xa   : > { %s1743_s20 = scalar_select %p40_p4, %s1674_s13, %s42_s19  }
   0xe   : > { %167 = sbr.rel (!%p51_p3) target bundleno = 37 (0x25), region = 24  ;;  %s169_s21 = sand.u32 (%p51_p3), 1, %s1674_s13  }
   0xf   : > { %s1374_s22 = smul.u32 (%p51_p3), 12, %s1682_s15 }
  0x10   : > { %s1550_s23 = smul.u32 (%p51_p3), 192, %s169_s21 }
  0x11   : > { %s1751_s26 = scalar_lea.vmem (%p51_p3), %s1983_s0, %s1374_s22 }
  0x12   : > { %v192_v0 = vld [vmem:[%s1751_s26] sm:$0xff] (%p51_p3)  ;;  %v196_v2 = vld [vmem:[%s1751_s26 + $0x48] sm:$0xff] (%p51_p3)  ;;  %s1756_s27 = scalar_lea.vmem (%p51_p3), [#allocation3], %s1550_s23  ;;  %v200_v4 = vld [vmem:[%s1751_s26 + $0x90] sm:$0xff] (%p51_p3) }
  0x13   : > { %v194_v1 = vld [vmem:[%s1751_s26 + $0x24] sm:$0xff] (%p51_p3)  ;;  %193 = vst [vmem:[%s1756_s27] sm:$0xff] (%p51_p3), %v192_v0  ;;  %197 = vst [vmem:[%s1756_s27 + $0x18] sm:$0xff] (%p51_p3), %v196_v2  ;;  %v198_v3 = vld [vmem:[%s1751_s26 + $0x6c] sm:$0xff] (%p51_p3) }
  0x14   : > { %195 = vst [vmem:[%s1756_s27 + $0xc] sm:$0xff] (%p51_p3), %v194_v1  ;;  %v202_v5 = vld [vmem:[%s1751_s26 + $0xb4] sm:$0xff] (%p51_p3)  ;;  %199 = vst [vmem:[%s1756_s27 + $0x24] sm:$0xff] (%p51_p3), %v198_v3  ;;  %v206_v7 = vld [vmem:[%s1751_s26 + $0xfc] sm:$0xff] (%p51_p3) }
  0x15   : > { %201 = vst [vmem:[%s1756_s27 + $0x30] sm:$0xff] %v200_v4  ;;  %203 = vst [vmem:[%s1756_s27 + $0x3c] sm:$0xff] %v202_v5  ;;  %v204_v6 = vld [vmem:[%s1751_s26 + $0xd8] sm:$0xff]  ;;  %v208_v8 = vld [vmem:[%s1751_s26 + $0x120] sm:$0xff] }
  0x16   : > { %205 = vst [vmem:[%s1756_s27 + $0x48] sm:$0xff] %v204_v6  ;;  %207 = vst [vmem:[%s1756_s27 + $0x54] sm:$0xff] %v206_v7  ;;  %v210_v9 = vld [vmem:[%s1751_s26 + $0x144] sm:$0xff]  ;;  %v214_v11 = vld [vmem:[%s1751_s26 + $0x18c] sm:$0xff] }
  0x17   : > { %209 = vst [vmem:[%s1756_s27 + $0x60] sm:$0xff] %v208_v8  ;;  %v212_v10 = vld [vmem:[%s1751_s26 + $0x168] sm:$0xff]  ;;  %211 = vst [vmem:[%s1756_s27 + $0x6c] sm:$0xff] %v210_v9  ;;  %v216_v12 = vld [vmem:[%s1751_s26 + $0x1b0] sm:$0xff] }
  0x18   : > { %213 = vst [vmem:[%s1756_s27 + $0x78] sm:$0xff] %v212_v10  ;;  %215 = vst [vmem:[%s1756_s27 + $0x84] sm:$0xff] %v214_v11  ;;  %v218_v13 = vld [vmem:[%s1751_s26 + $0x1d4] sm:$0xff]  ;;  %v222_v15 = vld [vmem:[%s1751_s26 + $0x21c] sm:$0xff] }
  0x19   : > { %v220_v14 = vld [vmem:[%s1751_s26 + $0x1f8] sm:$0xff]  ;;  %217 = vst [vmem:[%s1756_s27 + $0x90] sm:$0xff] %v216_v12  ;;  %219 = vst [vmem:[%s1756_s27 + $0x9c] sm:$0xff] %v218_v13  ;;  %v1268_v16 = vld [vmem:[%s1751_s26 + $0x8] sm:$0xf] }
  0x1a   : > { %221 = vst [vmem:[%s1756_s27 + $0xa8] sm:$0xff] %v220_v14  ;;  %v1270_v17 = vld [vmem:[%s1751_s26 + $0x2c] sm:$0xf]  ;;  %223 = vst [vmem:[%s1756_s27 + $0xb4] sm:$0xff] %v222_v15  ;;  %v1272_v18 = vld [vmem:[%s1751_s26 + $0x50] sm:$0xf] }
  0x1b   : > { %1269 = vst [vmem:[%s1756_s27 + $0x8] sm:$0xf] %v1268_v16  ;;  %1271 = vst [vmem:[%s1756_s27 + $0x14] sm:$0xf] %v1270_v17  ;;  %v1274_v19 = vld [vmem:[%s1751_s26 + $0x74] sm:$0xf] }
  0x1c   : > { %v1276_v20 = vld [vmem:[%s1751_s26 + $0x98] sm:$0xf]  ;;  %1273 = vst [vmem:[%s1756_s27 + $0x20] sm:$0xf] %v1272_v18  ;;  %1275 = vst [vmem:[%s1756_s27 + $0x2c] sm:$0xf] %v1274_v19 }
  0x1d   : > { %1277 = vst [vmem:[%s1756_s27 + $0x38] sm:$0xf] %v1276_v20  ;;  %v1278_v21 = vld [vmem:[%s1751_s26 + $0xbc] sm:$0xf]  ;;  %v1280_v22 = vld [vmem:[%s1751_s26 + $0xe0] sm:$0xf] }
  0x1e   : > { %v1282_v23 = vld [vmem:[%s1751_s26 + $0x104] sm:$0xf]  ;;  %1279 = vst [vmem:[%s1756_s27 + $0x44] sm:$0xf] %v1278_v21  ;;  %1281 = vst [vmem:[%s1756_s27 + $0x50] sm:$0xf] %v1280_v22 }
  0x1f   : > { %1283 = vst [vmem:[%s1756_s27 + $0x5c] sm:$0xf] %v1282_v23  ;;  %v1284_v24 = vld [vmem:[%s1751_s26 + $0x128] sm:$0xf]  ;;  %v1286_v25 = vld [vmem:[%s1751_s26 + $0x14c] sm:$0xf] }
  0x20   : > { %v1288_v26 = vld [vmem:[%s1751_s26 + $0x170] sm:$0xf]  ;;  %1285 = vst [vmem:[%s1756_s27 + $0x68] sm:$0xf] %v1284_v24  ;;  %1287 = vst [vmem:[%s1756_s27 + $0x74] sm:$0xf] %v1286_v25 }
  0x21   : > { %1289 = vst [vmem:[%s1756_s27 + $0x80] sm:$0xf] %v1288_v26  ;;  %v1290_v27 = vld [vmem:[%s1751_s26 + $0x194] sm:$0xf]  ;;  %v1292_v28 = vld [vmem:[%s1751_s26 + $0x1b8] sm:$0xf] }
  0x22   : > { %v1294_v29 = vld [vmem:[%s1751_s26 + $0x1dc] sm:$0xf]  ;;  %1291 = vst [vmem:[%s1756_s27 + $0x8c] sm:$0xf] %v1290_v27  ;;  %1293 = vst [vmem:[%s1756_s27 + $0x98] sm:$0xf] %v1292_v28 }
  0x23   : > { %1295 = vst [vmem:[%s1756_s27 + $0xa4] sm:$0xf] %v1294_v29  ;;  %v1296_v30 = vld [vmem:[%s1751_s26 + $0x200] sm:$0xf]  ;;  %v1298_v31 = vld [vmem:[%s1751_s26 + $0x224] sm:$0xf] }
  0x24   : > { %1297 = vst [vmem:[%s1756_s27 + $0xb0] sm:$0xf] %v1296_v30  ;;  %1299 = vst [vmem:[%s1756_s27 + $0xbc] sm:$0xf] %v1298_v31 }
  0x25 PF: > { %p1300_p6 = scmp.ge.s32.totalorder %s1686_s16, 1  ;;  %p267_p7 = scmp.lt.s32.totalorder %s1686_s16, 4 }
  0x27   : > { %p268_p8 = pnand %p1300_p6, %p267_p7 }
  0x28   : > { %s334_s28 = smul.u32 (!%p268_p8), 384, %s1678_s14  ;;  %s274_s29 = sand.u32 (!%p268_p8), 1, %s1670_s12  }
  0x29   : > { %271 = sbr.rel (%p268_p8) target bundleno = 416 (0x1a0), region = 50  ;;  %p1350_p9 = scmp.ne.s32.totalorder (!%p268_p8), %s1678_s14, 0 }
  0x2a   : > { %s1551_s30 = smul.u32 (!%p268_p8), 192, %s274_s29  ;;  %s367_s4 = sshra.s32 (!%p268_p8), %s334_s28, 3 }
  0x2b   : > { %s1301_s5 = sshll.u32 (!%p268_p8), %s367_s4, 2 }
  0x2c   : > { %s1826_s8 = scalar_lea.vmem (!%p268_p8), %s1984_s1, %s1301_s5  ;;  %s1828_s9 = scalar_lea.vmem (!%p268_p8), [#allocation3], %s1551_s30 }
  0x2d   : > { %v1592_v32 = vld [vmem:[%s1826_s8 + $0x40] sm:$0xff] (!%p268_p8)   ;;  %v1595_v35 = vld [vmem:[%s1826_s8 + $0x48] sm:$0xff] (!%p268_p8)   ;;  %v1598_v38 = vld [vmem:[%s1826_s8 + $0x50] sm:$0xff] (!%p268_p8)  }
  0x2e   : > { %v1593_v33 = vld [vmem:[%s1826_s8] sm:$0xff] (!%p268_p8)   ;;  %1438 = vmatprep.subr.bf16.mxu0 (!%p268_p8), %v1592_v32  ;;  %v1596_v36 = vld [vmem:[%s1826_s8 + $0x8] sm:$0xff] (!%p268_p8)   ;;  %v1599_v39 = vld [vmem:[%s1826_s8 + $0x10] sm:$0xff] (!%p268_p8)  }
  0x2f   : > { %v1594_v34 = vld [vmem:[%s1826_s8 + $0x80] sm:$0xff] (!%p268_p8)   ;;  %1439 = vmatpush3.bf16.msra.mxu0 (!%p268_p8), %v1593_v33  ;;  %v1597_v37 = vld [vmem:[%s1826_s8 + $0x88] sm:$0xff] (!%p268_p8)   ;;  %v1600_v40 = vld [vmem:[%s1826_s8 + $0x90] sm:$0xff] (!%p268_p8)  }
  0x30   : > { %1518 = vmatprep.subr.bf16.mxu1 %v1594_v34  ;;  %1440 = vmatprep.subr.bf16.mxu0 %v1595_v35  ;;  %v1601_v41 = vld [vmem:[%s1826_s8 + $0x58] sm:$0xff]   ;;  %v1604_v44 = vld [vmem:[%s1826_s8 + $0x60] sm:$0xff]   ;;  %v1607_v47 = vld [vmem:[%s1826_s8 + $0x68] sm:$0xff]  }
  0x31   : > { %1519 = vmatpush3.bf16.msra.mxu1 %v1594_v34  ;;  %v1602_v42 = vld [vmem:[%s1826_s8 + $0x18] sm:$0xff]   ;;  %v1606_v45 = vld [vmem:[%s1826_s8 + $0xa0] sm:$0xff]   ;;  %v1609_v48 = vld [vmem:[%s1826_s8 + $0xa8] sm:$0xff]  }
  0x32   : > { %1520 = vmatprep.subr.bf16.mxu1 %v1597_v37  ;;  %v1603_v43 = vld [vmem:[%s1826_s8 + $0x98] sm:$0xff]   ;;  %v1605_v46 = vld [vmem:[%s1826_s8 + $0x20] sm:$0xff]   ;;  %v1608_v49 = vld [vmem:[%s1826_s8 + $0x28] sm:$0xff]  }
  0x33   : > { %1441 = vmatpush3.bf16.msra.mxu0 %v1596_v36  ;;  %v1610_v50 = vld [vmem:[%s1826_s8 + $0x70] sm:$0xff]   ;;  %v1613_v53 = vld [vmem:[%s1826_s8 + $0x78] sm:$0xff]   ;;  %v1616_v58 = vld [vmem:[%s1828_s9] ss:$12 sps:$4 sm:$0xff]  }
  0x34   : > { %1442 = vmatprep.subr.bf16.mxu0 %v1598_v38  ;;  %v1611_v51 = vld [vmem:[%s1826_s8 + $0x30] sm:$0xff]   ;;  %v1615_v56 = vld [vmem:[%s1826_s8 + $0xb8] sm:$0xff]   ;;  %v1620_v60 = vld [vmem:[%s1828_s9 + $0x20] ss:$12 sps:$4 sm:$0xff]  }
  0x35   : > { %1521 = vmatpush3.bf16.msra.mxu1 %v1597_v37  ;;  %v1612_v52 = vld [vmem:[%s1826_s8 + $0xb0] sm:$0xff]   ;;  %v1614_v57 = vld [vmem:[%s1826_s8 + $0x38] sm:$0xff]   ;;  %v1636_v4 = vld [vmem:[%s1828_s9 + $0x80] ss:$12 sps:$4 sm:$0xff]  }
  0x36   : > { %1522 = vmatprep.subr.bf16.mxu1 %v1600_v40  ;;  %v1618_v54 = vld [vmem:[%s1828_s9 + $0x4] ss:$12 sps:$4 sm:$0xff]   ;;  %v1619_v55 = vld [vmem:[%s1828_s9 + $0x8] ss:$12 sps:$4 sm:$0xff]   ;;  %v1629_v3 = vld [vmem:[%s1828_s9 + $0x4c] ss:$12 sps:$4 sm:$0xff]  }
  0x37   : > { %1443 = vmatpush3.bf16.msra.mxu0 %v1599_v39  ;;  %723 = vmatprep.mubr.bf16.mxu0 %v1618_v54  ;;  %v1621_v59 = vld [vmem:[%s1828_s9 + $0x1c] ss:$12 sps:$4 sm:$0xff]   ;;  %v1627_v61 = vld [vmem:[%s1828_s9 + $0x38] ss:$12 sps:$4 sm:$0xff]   ;;  %v1624_v63 = vld [vmem:[%s1828_s9 + $0x34] ss:$12 sps:$4 sm:$0xff]  }
  0x38   : > { %1444 = vmatprep.subr.bf16.mxu0 %v1601_v41  ;;  %1534 = vmatprep.mubr.bf16.mxu1 %v1619_v55  ;;  %v1623_v62 = vld [vmem:[%s1828_s9 + $0x18] ss:$12 sps:$4 sm:$0xff]   ;;  %v1628_v0 = vld [vmem:[%s1828_s9 + $0x50] ss:$12 sps:$4 sm:$0xff]   ;;  %v1635_v1 = vld [vmem:[%s1828_s9 + $0x68] ss:$12 sps:$4 sm:$0xff]  }
  0x39   : > { %1523 = vmatpush3.bf16.msra.mxu1 %v1600_v40  ;;  %v1626_v2 = vld [vmem:[%s1828_s9 + $0x30] ss:$12 sps:$4 sm:$0xff]   ;;  %v1643_v5 = vld [vmem:[%s1828_s9 + $0x98] ss:$12 sps:$4 sm:$0xff]   ;;  %v1631_v6 = vld [vmem:[%s1828_s9 + $0x48] ss:$12 sps:$4 sm:$0xff]  }
  0x3a   : > { %1524 = vmatprep.subr.bf16.mxu1 %v1603_v43  ;;  %v1632_v7 = vld [vmem:[%s1828_s9 + $0x64] ss:$12 sps:$4 sm:$0xff]   ;;  %v1634_v9 = vld [vmem:[%s1828_s9 + $0x60] ss:$12 sps:$4 sm:$0xff]   ;;  %v1637_v10 = vld [vmem:[%s1828_s9 + $0x7c] ss:$12 sps:$4 sm:$0xff]  }
  0x3b   : > { %1445 = vmatpush3.bf16.msra.mxu0 %v1602_v42  ;;  %v1644_v8 = vld [vmem:[%s1828_s9 + $0xb0] ss:$12 sps:$4 sm:$0xff]   ;;  %v1639_v11 = vld [vmem:[%s1828_s9 + $0x78] ss:$12 sps:$4 sm:$0xff]   ;;  %v1640_v12 = vld [vmem:[%s1828_s9 + $0x94] ss:$12 sps:$4 sm:$0xff]  }
  0x3c   : > { %1446 = vmatprep.subr.bf16.mxu0 %v1604_v44  ;;  %v1642_v13 = vld [vmem:[%s1828_s9 + $0x90] ss:$12 sps:$4 sm:$0xff]   ;;  %v1645_v14 = vld [vmem:[%s1828_s9 + $0xac] ss:$12 sps:$4 sm:$0xff]   ;;  %v1647_v15 = vld [vmem:[%s1828_s9 + $0xa8] ss:$12 sps:$4 sm:$0xff]  }
  0x3d   : > { %1525 = vmatpush3.bf16.msra.mxu1 %v1603_v43 }
  0x3e   : > { %1526 = vmatprep.subr.bf16.mxu1 %v1606_v45 }
  0x3f   : > { %1447 = vmatpush3.bf16.msra.mxu0 %v1605_v46 }
  0x40   : > { %1448 = vmatprep.subr.bf16.mxu0 %v1607_v47 }
  0x41   : > { %1527 = vmatpush3.bf16.msra.mxu1 %v1606_v45 }
  0x42   : > { %1528 = vmatprep.subr.bf16.mxu1 %v1609_v48 }
  0x43   : > { %1449 = vmatpush3.bf16.msra.mxu0 %v1608_v49 }
  0x44   : > { %1450 = vmatprep.subr.bf16.mxu0 %v1610_v50 }
  0x45   : > { %1529 = vmatpush3.bf16.msra.mxu1 %v1609_v48 }
  0x46   : > { %1530 = vmatprep.subr.bf16.mxu1 %v1612_v52 }
  0x47   : > { %1451 = vmatpush3.bf16.msra.mxu0 %v1611_v51 }
  0x48   : > { %1452 = vmatprep.subr.bf16.mxu0 %v1613_v53 }
  0x49   : > { %1531 = vmatpush3.bf16.msra.mxu1 %v1612_v52 }
  0x4a   : > { %1532 = vmatprep.subr.bf16.mxu1 %v1615_v56 }
  0x4b   : > { %1453 = vmatpush3.bf16.msra.mxu0 %v1614_v57 }
  0x4d   : > { %1533 = vmatpush3.bf16.msra.mxu1 %v1615_v56 }
  0x4e   : > { %724 = vmatmul.mubr.bf16.vlgmr.msra.gmra.mrb[0].mxu0 %v1616_v58 }
  0x4f   : > { %731 = vmatprep.mubr.bf16.mxu0 %v1621_v59 }
  0x50   : > { %1535 = vmatmul.mubr.bf16.vlgmr.msra.gmra.mrb[0].mxu1 %v1620_v60 }
  0x51   : > { %1538 = vmatprep.mubr.bf16.mxu1 %v1627_v61 }
  0x56   : > { %732 = vmatmul.mubr.bf16.gmra.mrb[4].mxu0 %v1623_v62 }
  0x57   : > { %739 = vmatprep.mubr.bf16.mxu0 %v1624_v63 }
  0x58   : > { %1539 = vmatmul.mubr.bf16.gmra.mrb[4].mxu1 %v1628_v0 }
  0x59   : > { %1542 = vmatprep.mubr.bf16.mxu1 %v1635_v1 }
  0x5e   : > { %740 = vmatmul.mubr.bf16.gmra.mrb[8].mxu0 %v1626_v2 }
  0x5f   : > { %747 = vmatprep.mubr.bf16.mxu0 %v1629_v3 }
  0x60   : > { %1543 = vmatmul.mubr.bf16.gmra.mrb[8].mxu1 %v1636_v4 }
  0x61   : > { %1546 = vmatprep.mubr.bf16.mxu1 %v1643_v5 }
  0x66   : > { %748 = vmatmul.mubr.bf16.gmra.mrb[12].mxu0 %v1631_v6 }
  0x67   : > { %755 = vmatprep.mubr.bf16.mxu0 %v1632_v7 }
  0x68   : > { %1547 = vmatmul.mubr.bf16.gmra.mrb[12].mxu1 %v1644_v8 }
  0x6e   : > { %756 = vmatmul.mubr.bf16.gmra.mrb[16].mxu0 %v1634_v9 }
  0x6f   : > { %763 = vmatprep.mubr.bf16.mxu0 %v1637_v10 }
  0x76   : > { %764 = vmatmul.mubr.bf16.gmra.mrb[20].mxu0 %v1639_v11 }
  0x77   : > { %771 = vmatprep.mubr.bf16.mxu0 %v1640_v12 }
  0x7e   : > { %772 = vmatmul.mubr.bf16.gmra.mrb[24].mxu0 %v1642_v13 }
  0x7f   : > { %779 = vmatprep.mubr.bf16.mxu0 %v1645_v14 }
  0x86   : > { %780 = vmatmul.mubr.bf16.gmra.mrb[28].mxu0 %v1647_v15 }
 0x121   : > { %v1454_v16 = vpop.f32.mrb[0].mxu0 }
 0x122   : > { %v1455_v17 = vpop.f32.mrb[1].mxu0 }
 0x123   : > { %v1456_v18 = vadd.f32 %v1455_v17, %v1454_v16  ;;  %v1457_v19 = vpop.f32.mrb[2].mxu0  ;;  %v1536_v20 = vpop.f32.mrb[0].mxu1 }
 0x124   : > { %v1458_v21 = vpop.f32.mrb[3].mxu0  ;;  %v822_v22 = vpop.f32.mrb[1].mxu1 }
 0x125   : > { %v1459_v23 = vadd.f32 %v1458_v21, %v1457_v19  ;;  %v1878_v24 = vadd.f32 %v1456_v18, %v822_v22  ;;  %v1537_v25 = vpop.f32.mrb[2].mxu1 }
 0x126   : > { %v825_v26 = vpop.f32.mrb[3].mxu1 }
 0x127   : > { %v1880_v27 = vadd.f32 %v1459_v23, %v825_v26  ;;  %889 = vst [vmem:[#allocation2] sm:$0xff] (!%p1350_p9), %v1878_v24 }
 0x129   : > { %v1460_v28 = vpop.f32.mrb[4].mxu0  ;;  %890 = vst [vmem:[#allocation2 + $0x8] sm:$0xff] (!%p1350_p9), %v1880_v27 }
 0x12a   : > { %v1461_v29 = vpop.f32.mrb[5].mxu0 }
 0x12b   : > { %v1462_v30 = vadd.f32 %v1461_v29, %v1460_v28  ;;  %v1463_v31 = vpop.f32.mrb[6].mxu0  ;;  %v1540_v32 = vpop.f32.mrb[4].mxu1 }
 0x12c   : > { %v1464_v33 = vpop.f32.mrb[7].mxu0  ;;  %v838_v34 = vpop.f32.mrb[5].mxu1 }
 0x12d   : > { %v1882_v35 = vadd.f32 %v1536_v20, %v1462_v30  ;;  %v1465_v36 = vadd.f32 %v1464_v33, %v1463_v31  ;;  %v1541_v37 = vpop.f32.mrb[6].mxu1 }
 0x12e   : > { %v841_v38 = vpop.f32.mrb[7].mxu1 }
 0x12f   : > { %v1884_v39 = vadd.f32 %v1537_v25, %v1465_v36  ;;  %891 = vst [vmem:[#allocation2 + $0x10] sm:$0xff] (!%p1350_p9), %v1882_v35 }
 0x131   : > { %v1466_v40 = vpop.f32.mrb[8].mxu0  ;;  %892 = vst [vmem:[#allocation2 + $0x18] sm:$0xff] (!%p1350_p9), %v1884_v39 }
 0x132   : > { %v1467_v41 = vpop.f32.mrb[9].mxu0 }
 0x133   : > { %v1468_v42 = vadd.f32 %v1467_v41, %v1466_v40  ;;  %v1469_v43 = vpop.f32.mrb[10].mxu0  ;;  %v1544_v44 = vpop.f32.mrb[8].mxu1 }
 0x134   : > { %v1470_v45 = vpop.f32.mrb[11].mxu0  ;;  %v854_v46 = vpop.f32.mrb[9].mxu1 }
 0x135   : > { %v1471_v47 = vadd.f32 %v1470_v45, %v1469_v43  ;;  %v1886_v48 = vadd.f32 %v1468_v42, %v838_v34  ;;  %v1545_v49 = vpop.f32.mrb[10].mxu1 }
 0x136   : > { %v857_v50 = vpop.f32.mrb[11].mxu1 }
 0x137   : > { %v1888_v51 = vadd.f32 %v1471_v47, %v841_v38  ;;  %893 = vst [vmem:[#allocation2 + $0x20] sm:$0xff] (!%p1350_p9), %v1886_v48 }
 0x139   : > { %v1472_v52 = vpop.f32.mrb[12].mxu0  ;;  %894 = vst [vmem:[#allocation2 + $0x28] sm:$0xff] (!%p1350_p9), %v1888_v51 }
 0x13a   : > { %v1473_v53 = vpop.f32.mrb[13].mxu0 }
 0x13b   : > { %v1474_v54 = vadd.f32 %v1473_v53, %v1472_v52  ;;  %v1475_v55 = vpop.f32.mrb[14].mxu0  ;;  %v1548_v56 = vpop.f32.mrb[12].mxu1 }
 0x13c   : > { %v1476_v57 = vpop.f32.mrb[15].mxu0  ;;  %v870_v58 = vpop.f32.mrb[13].mxu1 }
 0x13d   : > { %v1890_v59 = vadd.f32 %v1540_v32, %v1474_v54  ;;  %v1477_v60 = vadd.f32 %v1476_v57, %v1475_v55  ;;  %v1549_v61 = vpop.f32.mrb[14].mxu1 }
 0x13e   : > { %v873_v62 = vpop.f32.mrb[15].mxu1 }
 0x13f   : > { %v1892_v63 = vadd.f32 %v1541_v37, %v1477_v60  ;;  %895 = vst [vmem:[#allocation2 + $0x30] sm:$0xff] (!%p1350_p9), %v1890_v59 }
 0x141   : > { %v1478_v0 = vpop.f32.mrb[16].mxu0  ;;  %896 = vst [vmem:[#allocation2 + $0x38] sm:$0xff] (!%p1350_p9), %v1892_v63 }
 0x142   : > { %v1479_v1 = vpop.f32.mrb[17].mxu0 }
 0x143   : > { %v1480_v2 = vadd.f32 %v1479_v1, %v1478_v0  ;;  %v1481_v3 = vpop.f32.mrb[18].mxu0 }
 0x144   : > { %v1482_v4 = vpop.f32.mrb[19].mxu0 }
 0x145   : > { %v1483_v5 = vadd.f32 %v1482_v4, %v1481_v3  ;;  %v1894_v6 = vadd.f32 %v1480_v2, %v854_v46 }
 0x147   : > { %v1896_v7 = vadd.f32 %v1483_v5, %v857_v50  ;;  %897 = vst [vmem:[#allocation2 + $0x40] sm:$0xff] (!%p1350_p9), %v1894_v6 }
 0x149   : > { %v1484_v8 = vpop.f32.mrb[20].mxu0  ;;  %898 = vst [vmem:[#allocation2 + $0x48] sm:$0xff] (!%p1350_p9), %v1896_v7 }
 0x14a   : > { %v1485_v9 = vpop.f32.mrb[21].mxu0 }
 0x14b   : > { %v1486_v10 = vadd.f32 %v1485_v9, %v1484_v8  ;;  %v1487_v11 = vpop.f32.mrb[22].mxu0 }
 0x14c   : > { %v1488_v12 = vpop.f32.mrb[23].mxu0 }
 0x14d   : > { %v1898_v13 = vadd.f32 %v1544_v44, %v1486_v10  ;;  %v1489_v14 = vadd.f32 %v1488_v12, %v1487_v11 }
 0x14f   : > { %v1900_v15 = vadd.f32 %v1545_v49, %v1489_v14  ;;  %899 = vst [vmem:[#allocation2 + $0x50] sm:$0xff] (!%p1350_p9), %v1898_v13 }
 0x151   : > { %v1490_v16 = vpop.f32.mrb[24].mxu0  ;;  %900 = vst [vmem:[#allocation2 + $0x58] sm:$0xff] (!%p1350_p9), %v1900_v15 }
 0x152   : > { %v1491_v17 = vpop.f32.mrb[25].mxu0 }
 0x153   : > { %v1492_v18 = vadd.f32 %v1491_v17, %v1490_v16  ;;  %v1493_v19 = vpop.f32.mrb[26].mxu0 }
 0x154   : > { %v1494_v20 = vpop.f32.mrb[27].mxu0 }
 0x155   : > { %v1495_v21 = vadd.f32 %v1494_v20, %v1493_v19  ;;  %v1902_v22 = vadd.f32 %v1492_v18, %v870_v58 }
 0x157   : > { %v1904_v23 = vadd.f32 %v1495_v21, %v873_v62  ;;  %901 = vst [vmem:[#allocation2 + $0x60] sm:$0xff] (!%p1350_p9), %v1902_v22 }
 0x159   : > { %v1496_v25 = vpop.f32.mrb[28].mxu0  ;;  %888 = sbr.rel (%p1350_p9) target bundleno = 354 (0x162), region = 58  ;;  %902 = vst [vmem:[#allocation2 + $0x68] sm:$0xff] (!%p1350_p9), %v1904_v23 }
 0x15a   : > { %v1497_v26 = vpop.f32.mrb[29].mxu0 }
 0x15b   : > { %v1498_v28 = vadd.f32 %v1497_v26, %v1496_v25  ;;  %v1499_v29 = vpop.f32.mrb[30].mxu0 }
 0x15c   : > { %v1500_v30 = vpop.f32.mrb[31].mxu0 }
 0x15d   : > { %v879_v31 = vadd.f32 %v1548_v56, %v1498_v28  ;;  %v1501_v32 = vadd.f32 %v1500_v30, %v1499_v29 }
 0x15f   : > { %v1906_v33 = vadd.f32 %v1549_v61, %v1501_v32  ;;  %903 = vst [vmem:[#allocation2 + $0x70] sm:$0xff] (!%p1350_p9), %v879_v31 }
 0x161   : > { %904 = vst [vmem:[#allocation2 + $0x78] sm:$0xff] %v1906_v33 }
 0x162 PF: > { %p1351_p10 = scmp.le.s32.totalorder %s1678_s14, 0 }
 0x163   : > { %v909_v34 = vld [vmem:[#allocation2] sm:$0xff] (!%p1351_p10)  ;;  %v910_v36 = vld [vmem:[#allocation2 + $0x8] sm:$0xff] (!%p1351_p10)  ;;  %v911_v37 = vld [vmem:[#allocation2 + $0x10] sm:$0xff] (!%p1351_p10) }
 0x164   : > { %908 = sbr.rel (%p1351_p10) target bundleno = 366 (0x16e), region = 62  ;;  %v925_v38 = vadd.f32 (!%p1351_p10), %v909_v34, %v1878_v24  ;;  %v926_v40 = vadd.f32 (!%p1351_p10), %v910_v36, %v1880_v27  ;;  %v927_v41 = vadd.f32 (!%p1351_p10), %v911_v37, %v1882_v35  ;;  %v912_v42 = vld [vmem:[#allocation2 + $0x18] sm:$0xff] (!%p1351_p10)  ;;  %v913_v43 = vld [vmem:[#allocation2 + $0x20] sm:$0xff] (!%p1351_p10)  ;;  %v914_v44 = vld [vmem:[#allocation2 + $0x28] sm:$0xff] (!%p1351_p10) }
 0x165   : > { %v928_v45 = vadd.f32 (!%p1351_p10), %v912_v42, %v1884_v39  ;;  %v929_v46 = vadd.f32 (!%p1351_p10), %v913_v43, %v1886_v48  ;;  %v930_v47 = vadd.f32 (!%p1351_p10), %v914_v44, %v1888_v51  ;;  %v915_v49 = vld [vmem:[#allocation2 + $0x30] sm:$0xff] (!%p1351_p10)  ;;  %v916_v50 = vld [vmem:[#allocation2 + $0x38] sm:$0xff] (!%p1351_p10)  ;;  %v917_v52 = vld [vmem:[#allocation2 + $0x40] sm:$0xff] (!%p1351_p10) }
 0x166   : > { %941 = vst [vmem:[#allocation2] sm:$0xff] (!%p1351_p10), %v925_v38  ;;  %942 = vst [vmem:[#allocation2 + $0x8] sm:$0xff] (!%p1351_p10), %v926_v40  ;;  %v931_v24 = vadd.f32 (!%p1351_p10), %v915_v49, %v1890_v59  ;;  %v932_v27 = vadd.f32 (!%p1351_p10), %v916_v50, %v1892_v63  ;;  %v933_v35 = vadd.f32 (!%p1351_p10), %v917_v52, %v1894_v6  ;;  %v918_v53 = vld [vmem:[#allocation2 + $0x48] sm:$0xff] (!%p1351_p10)  ;;  %v919_v54 = vld [vmem:[#allocation2 + $0x50] sm:$0xff] (!%p1351_p10) }
 0x167   : > { %943 = vst [vmem:[#allocation2 + $0x10] sm:$0xff] (!%p1351_p10), %v927_v41  ;;  %v920_v55 = vld [vmem:[#allocation2 + $0x58] sm:$0xff] (!%p1351_p10)  ;;  %944 = vst [vmem:[#allocation2 + $0x18] sm:$0xff] (!%p1351_p10), %v928_v45  ;;  %v934_v39 = vadd.f32 (!%p1351_p10), %v918_v53, %v1896_v7  ;;  %v935_v48 = vadd.f32 (!%p1351_p10), %v919_v54, %v1898_v13  ;;  %v921_v56 = vld [vmem:[#allocation2 + $0x60] sm:$0xff] (!%p1351_p10) }
 0x168   : > { %945 = vst [vmem:[#allocation2 + $0x20] sm:$0xff] (!%p1351_p10), %v929_v46  ;;  %946 = vst [vmem:[#allocation2 + $0x28] sm:$0xff] (!%p1351_p10), %v930_v47  ;;  %v936_v51 = vadd.f32 (!%p1351_p10), %v920_v55, %v1900_v15  ;;  %v922_v57 = vld [vmem:[#allocation2 + $0x68] sm:$0xff] (!%p1351_p10)  ;;  %v923_v58 = vld [vmem:[#allocation2 + $0x70] sm:$0xff] (!%p1351_p10)  ;;  %v937_v59 = vadd.f32 (!%p1351_p10), %v921_v56, %v1902_v22 }
 0x169   : > { %947 = vst [vmem:[#allocation2 + $0x30] sm:$0xff] (!%p1351_p10), %v931_v24  ;;  %948 = vst [vmem:[#allocation2 + $0x38] sm:$0xff] (!%p1351_p10), %v932_v27  ;;  %v938_v60 = vadd.f32 (!%p1351_p10), %v922_v57, %v1904_v23  ;;  %v939_v61 = vadd.f32 (!%p1351_p10), %v923_v58, %v879_v31  ;;  %v924_v62 = vld [vmem:[#allocation2 + $0x78] sm:$0xff] (!%p1351_p10) }
 0x16a   : > { %949 = vst [vmem:[#allocation2 + $0x40] sm:$0xff] (!%p1351_p10), %v933_v35  ;;  %950 = vst [vmem:[#allocation2 + $0x48] sm:$0xff] (!%p1351_p10), %v934_v39  ;;  %v940_v63 = vadd.f32 (!%p1351_p10), %v924_v62, %v1906_v33 }
 0x16b   : > { %951 = vst [vmem:[#allocation2 + $0x50] sm:$0xff] %v935_v48  ;;  %952 = vst [vmem:[#allocation2 + $0x58] sm:$0xff] %v936_v51 }
 0x16c   : > { %953 = vst [vmem:[#allocation2 + $0x60] sm:$0xff] %v937_v59  ;;  %954 = vst [vmem:[#allocation2 + $0x68] sm:$0xff] %v938_v60 }
 0x16d   : > { %955 = vst [vmem:[#allocation2 + $0x70] sm:$0xff] %v939_v61  ;;  %956 = vst [vmem:[#allocation2 + $0x78] sm:$0xff] %v940_v63 }
 0x16e PF: > { %p1352_p11 = scmp.ne.s32.totalorder %s1678_s14, 2 }
 0x16f   : > { %vm1115_vm0 = vcmask (!%p1352_p11), 1040384   ;;  %vm1117_vm1 = vcmask (!%p1352_p11), 1041408  }
 0x170   : > { %960 = sbr.rel (%p1352_p11) target bundleno = 416 (0x1a0), region = 66  ;;  %v961_v0 = vld [vmem:[#allocation2] sm:$0xff] (!%p1352_p11)  ;;  %v962_v1 = vld [vmem:[#allocation2 + $0x8] sm:$0xff] (!%p1352_p11) }
 0x171   : > { %v963_v2 = vld [vmem:[#allocation2 + $0x10] sm:$0xff] (!%p1352_p11)  ;;  %v1394_v3 = vpack.c.bf16 (!%p1352_p11), %v962_v1, %v961_v0  ;;  %v1057_v4 = vadd.f32 (!%p1352_p11), %v962_v1, %v961_v0  ;;  %v1078_v5 = vmul.f32 (!%p1352_p11), %v961_v0, %v961_v0  ;;  %v1079_v6 = vmul.f32 (!%p1352_p11), %v962_v1, %v962_v1  ;;  %v964_v7 = vld [vmem:[#allocation2 + $0x18] sm:$0xff] (!%p1352_p11) }
 0x172   : > { %v965_v8 = vld [vmem:[#allocation2 + $0x20] sm:$0xff] (!%p1352_p11)  ;;  %v966_v9 = vld [vmem:[#allocation2 + $0x28] sm:$0xff] (!%p1352_p11)  ;;  %v1399_v10 = vpack.c.bf16 (!%p1352_p11), %v964_v7, %v963_v2  ;;  %v1080_v11 = vmul.f32 (!%p1352_p11), %v963_v2, %v963_v2  ;;  %v1081_v16 = vmul.f32 (!%p1352_p11), %v964_v7, %v964_v7 }
 0x173   : > { %v1404_v12 = vpack.c.bf16 (!%p1352_p11), %v966_v9, %v965_v8  ;;  %v967_v13 = vld [vmem:[#allocation2 + $0x30] sm:$0xff] (!%p1352_p11)  ;;  %1395 = vst [vmem:[%s1985_s2] sm:$0xff] (!%p1352_p11), %v1394_v3   ;;  %v1094_v14 = vadd.f32 (!%p1352_p11), %v1079_v6, %v1078_v5  ;;  %v1058_v15 = vadd.f32 (!%p1352_p11), %v1057_v4, %v963_v2  ;;  %v968_v17 = vld [vmem:[#allocation2 + $0x38] sm:$0xff] (!%p1352_p11)  ;;  %v1082_v26 = vmul.f32 (!%p1352_p11), %v965_v8, %v965_v8  ;;  %v973_v29 = vld [vmem:[#allocation2 + $0x60] sm:$0xff] (!%p1352_p11) }
 0x174   : > { %v969_v18 = vld [vmem:[#allocation2 + $0x40] sm:$0xff] (!%p1352_p11)  ;;  %v970_v19 = vld [vmem:[#allocation2 + $0x48] sm:$0xff] (!%p1352_p11)  ;;  %1431 = vst [vmem:[%s1985_s2 + $0x8] sm:$0xff] (!%p1352_p11), %v1399_v10   ;;  %v1409_v20 = vpack.c.bf16 (!%p1352_p11), %v968_v17, %v967_v13  ;;  %v1083_v36 = vmul.f32 (!%p1352_p11), %v966_v9, %v966_v9  ;;  %v975_v37 = vld [vmem:[#allocation2 + $0x70] sm:$0xff] (!%p1352_p11)  ;;  %v1084_v43 = vmul.f32 (!%p1352_p11), %v967_v13, %v967_v13  ;;  %v1085_v46 = vmul.f32 (!%p1352_p11), %v968_v17, %v968_v17 }
 0x175   : > { %1432 = vst [vmem:[%s1985_s2 + $0x10] sm:$0xff] (!%p1352_p11), %v1404_v12   ;;  %v1414_v21 = vpack.c.bf16 (!%p1352_p11), %v970_v19, %v969_v18  ;;  %v971_v22 = vld [vmem:[#allocation2 + $0x50] sm:$0xff] (!%p1352_p11)  ;;  %v1059_v23 = vadd.f32 (!%p1352_p11), %v1058_v15, %v964_v7  ;;  %v1095_v25 = vadd.f32 (!%p1352_p11), %v1094_v14, %v1080_v11  ;;  %v972_v28 = vld [vmem:[#allocation2 + $0x58] sm:$0xff] (!%p1352_p11)  ;;  %v974_v30 = vld [vmem:[#allocation2 + $0x68] sm:$0xff] (!%p1352_p11)  ;;  %v1086_v50 = vmul.f32 (!%p1352_p11), %v969_v18, %v969_v18 }
 0x176   : > { %1433 = vst [vmem:[%s1985_s2 + $0x18] sm:$0xff] (!%p1352_p11), %v1409_v20   ;;  %v1419_v31 = vpack.c.bf16 (!%p1352_p11), %v972_v28, %v971_v22  ;;  %v1424_v32 = vpack.c.bf16 (!%p1352_p11), %v974_v30, %v973_v29  ;;  %v976_v38 = vld [vmem:[#allocation2 + $0x78] sm:$0xff] (!%p1352_p11)  ;;  %v1087_v27 = vmul.f32 (!%p1352_p11), %v970_v19, %v970_v19  ;;  %v1088_v54 = vmul.f32 (!%p1352_p11), %v971_v22, %v971_v22 }
 0x177   : > { %1434 = vst [vmem:[%s1985_s2 + $0x20] sm:$0xff] %v1414_v21   ;;  %v1096_v33 = vadd.f32 %v1095_v25, %v1081_v16  ;;  %v1060_v34 = vadd.f32 %v1059_v23, %v965_v8  ;;  %v1429_v40 = vpack.c.bf16 %v976_v38, %v975_v37  ;;  %v1089_v48 = vmul.f32 %v972_v28, %v972_v28 }
 0x178   : > { %1435 = vst [vmem:[%s1985_s2 + $0x28] sm:$0xff] %v1419_v31   ;;  %1436 = vst [vmem:[%s1985_s2 + $0x30] sm:$0xff] %v1424_v32   ;;  %v1090_v57 = vmul.f32 %v973_v29, %v973_v29  ;;  %v1091_v60 = vmul.f32 %v974_v30, %v974_v30  ;;  %v1092_v63 = vmul.f32 %v975_v37, %v975_v37 }
 0x179   : > { %v1061_v41 = vadd.f32 %v1060_v34, %v966_v9  ;;  %v1097_v42 = vadd.f32 %v1096_v33, %v1082_v26  ;;  %1437 = vst [vmem:[%s1985_s2 + $0x38] sm:$0xff] %v1429_v40   ;;  %v1093_v2 = vmul.f32 %v976_v38, %v976_v38 }
 0x17b   : > { %v1098_v44 = vadd.f32 %v1097_v42, %v1083_v36  ;;  %v1062_v45 = vadd.f32 %v1061_v41, %v967_v13 }
 0x17d   : > { %v1063_v47 = vadd.f32 %v1062_v45, %v968_v17  ;;  %v1099_v49 = vadd.f32 %v1098_v44, %v1084_v43 }
 0x17f   : > { %v1100_v52 = vadd.f32 %v1099_v49, %v1085_v46  ;;  %v1064_v24 = vadd.f32 %v1063_v47, %v969_v18 }
 0x181   : > { %v1065_v35 = vadd.f32 %v1064_v24, %v970_v19  ;;  %v1101_v53 = vadd.f32 %v1100_v52, %v1086_v50 }
 0x183   : > { %v1102_v55 = vadd.f32 %v1101_v53, %v1087_v27  ;;  %v1066_v39 = vadd.f32 %v1065_v35, %v971_v22 }
 0x185   : > { %v1067_v51 = vadd.f32 %v1066_v39, %v972_v28  ;;  %v1103_v56 = vadd.f32 %v1102_v55, %v1088_v54 }
 0x187   : > { %v1104_v58 = vadd.f32 %v1103_v56, %v1089_v48  ;;  %v1068_v59 = vadd.f32 %v1067_v51, %v973_v29 }
 0x189   : > { %v1069_v61 = vadd.f32 %v1068_v59, %v974_v30  ;;  %v1105_v62 = vadd.f32 %v1104_v58, %v1090_v57 }
 0x18b   : > { %v1106_v0 = vadd.f32 %v1105_v62, %v1091_v60  ;;  %v1070_v1 = vadd.f32 %v1069_v61, %v975_v37 }
 0x18d   : > { %v1071_v3 = vadd.f32 %v1070_v1, %v976_v38  ;;  %v1107_v4 = vadd.f32 %v1106_v0, %v1092_v63 }
 0x18f   : > { %v1072_v5 = vrot.slane %v1071_v3, 4  ;;  %v1108_v6 = vadd.f32 %v1107_v4, %v1093_v2 }
 0x191   : > { %v1073_v7 = vadd.f32 %v1072_v5, %v1071_v3  ;;  %v1109_v8 = vrot.slane %v1108_v6, 4 }
 0x193   : > { %v1074_v9 = vrot.slane %v1073_v7, 2  ;;  %v1110_v10 = vadd.f32 %v1109_v8, %v1108_v6 }
 0x195   : > { %v1075_v11 = vadd.f32 %v1074_v9, %v1073_v7  ;;  %v1111_v12 = vrot.slane %v1110_v10, 2 }
 0x197   : > { %v1076_v13 = vrot.slane %v1075_v11, 1  ;;  %v1112_v14 = vadd.f32 %v1111_v12, %v1110_v10 }
 0x199   : > { %v1077_v15 = vadd.f32 %v1076_v13, %v1075_v11  ;;  %v1113_v16 = vrot.slane %v1112_v14, 1 }
 0x19b   : > { %v1114_v17 = vadd.f32 %v1113_v16, %v1112_v14 }
 0x19d   : > { %v1116_v18 = vsel %vm1115_vm0, %v1077_v15, %v1114_v17 }
 0x19e   : > { %v1118_v19 = vsel %vm1117_vm1, %v1116_v18, 0.0 }
 0x19f   : > { %1119 = vst [vmem:[%s1986_s3] sm:$0xff] %v1118_v19 }
 0x1a0 PF: > { %s14_s16 = sadd.s32 1, %s1686_s16   ;;  %s1987_s12 = smov %s1674_s13 }
 0x1a1   : > { %p11_p12 = scmp.ge.s32.totalorder %s14_s16, 5   ;;  %s1988_s13 = smov %s1743_s20 }
 0x1a2   : > { %s1989_s14 = smov %s1682_s15  ;;  %s1990_s15 = smov %s1992_s17 }
 0x1a3   :  { %13 = sbr.rel (!%p11_p12) target bundleno = 3 (0x3), region = 123 }

</bundles_post_ra>
